<compile_context>
chip_gen: v7x
topology: tpu7x:2x2x1
jax: 0.10.0
libtpu: 0.0.40
codegen_flags: <defaults>
</compile_context>

<pallas_src>
import functools

import jax
import jax.numpy as jnp
from jax import lax
from jax.experimental import pallas as pl
from jax.experimental.pallas import tpu as pltpu


# ----------------------------------------------------------------------------
# Pallas kernel: block_n batch elements per grid step, lane-concatenated
# (C, block_n*H_pad) layout inside.
# ----------------------------------------------------------------------------
def _attentive_conv_kernel(src_ref, foc_ref, w_src_ref, w_foc_ref, b_ref,
                           w_out_ref, b_ctx_ref, out_ref,
                           src_sc, foc_sc, rhs_sc, *, kh, compute_dtype):
    pad = kh // 2
    block_n, C, hs = src_ref.shape
    hf = foc_ref.shape[2]
    hs_p = hs + kh - 1                      # per-sample padded segment stride
    hf_p = hf + kh - 1
    ws = block_n * hs_p                     # concatenated source width (valid)
    wf = block_n * hf_p                     # concatenated focus width  (valid)

    # ---- in-kernel cast + zero-pad + batch lane-concatenation ---------------
    # Scratch width has kh-1 extra zero lanes so every shifted slice below is a
    # static, full-width slice (no wraparound handling needed).
    src_sc[...] = jnp.zeros_like(src_sc)
    foc_sc[...] = jnp.zeros_like(foc_sc)
    for b in range(block_n):
        src_sc[:, b * hs_p + pad: b * hs_p + pad + hs] = src_ref[b].astype(jnp.float32)
        foc_sc[:, b * hf_p + pad: b * hf_p + pad + hf] = foc_ref[b].astype(jnp.float32)

    # ---- gated scoring: ONE MXU matmul per stream for the whole block -------
    sc_src = jnp.dot(w_src_ref[...], src_sc[...].astype(compute_dtype),
                     preferred_element_type=jnp.float32)      # (2kh+2, ws+kh-1)
    sc_foc = jnp.dot(w_foc_ref[...], foc_sc[...].astype(compute_dtype),
                     preferred_element_type=jnp.float32)      # (2kh+2, wf+kh-1)

    def gated(sc, b_off, w):
        # tri-conv = kh shifted row adds over the full concatenated width;
        # uni-conv = centre-shifted row.  Valid score for sample b at position
        # h sits at concatenated column b*seg_stride + h.
        tri_c = sc[0:1, 0:w]
        tri_g = sc[kh:kh + 1, 0:w]
        for d in range(1, kh):
            tri_c = tri_c + sc[d:d + 1, d:d + w]
            tri_g = tri_g + sc[kh + d:kh + d + 1, d:d + w]
        tri_c = tri_c + b_ref[b_off + 0]
        tri_g = tri_g + b_ref[b_off + 1]
        uni_c = sc[2 * kh:2 * kh + 1, pad:pad + w] + b_ref[b_off + 2]
        uni_g = sc[2 * kh + 1:2 * kh + 2, pad:pad + w] + b_ref[b_off + 3]
        return (jnp.tanh(tri_c) * jax.nn.sigmoid(tri_g)
                + jnp.tanh(uni_c) * jax.nn.sigmoid(uni_g))

    s_src = gated(sc_src, 0, ws)                              # (1, ws) f32
    s_foc = gated(sc_foc, 4, wf)                              # (1, wf) f32

    # ---- fused output-conv RHS: kh shifted focus taps + attentive context ---
    for d in range(kh):
        rhs_sc[d * C:(d + 1) * C, :] = foc_sc[:, d:d + wf]
    rhs_sc[kh * C:(kh + 1) * C, :] = jnp.zeros((C, wf), jnp.float32)

    # ---- per-sample attention (invariants hoisted out of the loop) ----------
    ii = lax.broadcasted_iota(jnp.int32, (hs, hs), 0)
    jj = lax.broadcasted_iota(jnp.int32, (hs, hs), 1)
    diag = ii == jj
    for b in range(block_n):
        ss = s_src[:, b * hs_p: b * hs_p + hs]                # (1, hs)
        sf = s_foc[:, b * hf_p: b * hf_p + hf]                # (1, hf)
        # (1, hs) -> (hs, 1) with a diagonal select + lane reduce (keeps the
        # MXU / risky transposes off the softmax path; fine at sentence scale).
        ss_col = jnp.sum(jnp.where(diag, ss, 0.0), axis=1, keepdims=True)
        energy = ss_col * sf                                  # (hs, hf), rank-1
        m = jnp.max(energy, axis=0, keepdims=True)
        p = jnp.exp(energy - m)
        attn = p * pl.reciprocal(jnp.sum(p, axis=0, keepdims=True), approx=True)
        src_b = src_sc[:, b * hs_p + pad: b * hs_p + pad + hs]   # (C, hs) f32
        rhs_sc[kh * C:(kh + 1) * C, b * hf_p: b * hf_p + hf] = jnp.dot(
            src_b, attn, preferred_element_type=jnp.float32)     # (C, hf)

    # ---- single fused output matmul + bias + tanh, one lane-dense store -----
    res = jnp.dot(w_out_ref[...], rhs_sc[...],
                  preferred_element_type=jnp.float32)         # (O, wf)
    out_ref[0] = jnp.tanh(res + b_ctx_ref[...]).astype(out_ref.dtype)


# ----------------------------------------------------------------------------
# Parameter packing (PyTorch Conv2d/Conv1d weights -> kernel layout)
# ----------------------------------------------------------------------------
def _pack_params(p, kh, C, O, dtype):
    def tri_rows(name):                                   # (kh, C), row d = tap d
        return jnp.transpose(p[name + '.weight'][0, :, :, 0])

    def uni_row(name):                                    # (1, C)
        return p[name + '.weight'][0, :, 0, 0][None, :]

    w_src = jnp.concatenate([tri_rows('conv_tri_source'), tri_rows('gate_tri_source'),
                             uni_row('conv_uni_source'), uni_row('gate_uni_source')],
                            axis=0).astype(dtype)          # (2*kh+2, C)
    w_foc = jnp.concatenate([tri_rows('conv_tri_foci'), tri_rows('gate_tri_foci'),
                             uni_row('conv_uni_foci'), uni_row('gate_uni_foci')],
                            axis=0).astype(dtype)          # (2*kh+2, C)
    b = jnp.stack([
        p['conv_tri_source.bias'][0], p['gate_tri_source.bias'][0],
        p['conv_uni_source.bias'][0], p['gate_uni_source.bias'][0],
        p['conv_tri_foci.bias'][0], p['gate_tri_foci.bias'][0],
        p['conv_uni_foci.bias'][0], p['gate_uni_foci.bias'][0],
    ]).astype(jnp.float32)                                 # (8,)

    w_conv = jnp.transpose(p['conv.weight'][:, :, :, 0], (2, 0, 1))   # (kh, O, C)
    w_ctx_full = p['context_conv.weight'][:, :, 0]                    # (O, 2C)
    # Fold the focus half of context_conv into the centre tap of self.conv.
    w_conv = w_conv.at[kh // 2].add(w_ctx_full[:, C:])
    # Fused output weight: [conv tap 0 | ... | conv tap kh-1 | context half].
    w_out = jnp.concatenate([w_conv[d] for d in range(kh)] + [w_ctx_full[:, :C]],
                            axis=1).astype(jnp.float32)               # (O, (kh+1)*C)
    b_ctx = p['context_conv.bias'].reshape(O, 1).astype(jnp.float32)
    return w_src, w_foc, b, w_out, b_ctx


# ----------------------------------------------------------------------------
# block_n policy: grid = 1 on single-TC chips (v5e/v6e), even split on v7x,
# awkward N padded up instead of degrading block_n.
# ----------------------------------------------------------------------------
def _pick_block_n(N, block_n):
    if block_n is None:
        two_core = False
        try:
            two_core = 'v7' in jax.devices()[0].device_kind.lower()
        except Exception:
            pass
        block_n = pl.cdiv(N, 2) if (two_core and N >= 2) else N
        block_n = min(block_n, 16)   # bound trace-time unroll of the attn loop
    block_n = max(1, min(block_n, N))
    grid_n = pl.cdiv(N, block_n)
    return block_n, grid_n, grid_n * block_n


# ----------------------------------------------------------------------------
# Wrapper: NCHW in / NCHW out.
# ----------------------------------------------------------------------------
def attentive_conv2d_forward(source, focus, params, *, kernel_size,
                             compute_dtype=jnp.bfloat16, block_n=None):
    kh, kw = kernel_size
    assert kw == 1 and kh % 2 == 1, "expects kernel_size = (odd_kh, 1)"
    N, C, Hs, W = source.shape
    _, _, Hf, _ = focus.shape
    assert W == 1, "layout requires W == 1 (word vectors in channels)"
    O = params['conv.weight'].shape[0]

    block_n, grid_n, n_pad = _pick_block_n(N, block_n)
    hs_p, hf_p = Hs + kh - 1, Hf + kh - 1
    wf = block_n * hf_p
    nsc = 2 * kh + 2

    # NCHW -> (N, C, H) is a free reshape; cast + pad + lane-concat happen
    # in-kernel, so there is no host pass over the activations (batch pad only
    # when N is not a multiple of block_n).
    src = source.reshape(N, C, Hs)
    foc = focus.reshape(N, C, Hf)
    if n_pad != N:
        src = jnp.pad(src, ((0, n_pad - N), (0, 0), (0, 0)))
        foc = jnp.pad(foc, ((0, n_pad - N), (0, 0), (0, 0)))

    w_src, w_foc, b, w_out, b_ctx = _pack_params(params, kh, C, O, compute_dtype)

    out = pl.pallas_call(
        functools.partial(_attentive_conv_kernel, kh=kh, compute_dtype=compute_dtype),
        out_shape=jax.ShapeDtypeStruct((grid_n, O, wf), jnp.float32),
        grid=(grid_n,),
        in_specs=[
            pl.BlockSpec((block_n, C, Hs), lambda n: (n, 0, 0)),   # raw source
            pl.BlockSpec((block_n, C, Hf), lambda n: (n, 0, 0)),   # raw focus
            pl.BlockSpec((nsc, C), lambda n: (0, 0)),              # source scoring weights
            pl.BlockSpec((nsc, C), lambda n: (0, 0)),              # focus scoring weights
            pl.BlockSpec(memory_space=pltpu.MemorySpace.SMEM),     # 8 scoring biases
            pl.BlockSpec((O, (kh + 1) * C), lambda n: (0, 0)),     # fused output weights
            pl.BlockSpec((O, 1), lambda n: (0, 0)),                # context_conv bias
        ],
        out_specs=pl.BlockSpec((1, O, wf), lambda n: (n, 0, 0)),   # lane-dense slab
        scratch_shapes=[
            pltpu.VMEM((C, block_n * hs_p + kh - 1), jnp.float32),   # padded src block
            pltpu.VMEM((C, wf + kh - 1), jnp.float32),               # padded foc block
            pltpu.VMEM(((kh + 1) * C, wf), jnp.float32),             # stacked output RHS
        ],
        compiler_params=pltpu.CompilerParams(
            dimension_semantics=("parallel",)),
    )(src, foc, w_src, w_foc, b, w_out, b_ctx)

    # Host-side layout restore (output-only pass): strip per-sample pad
    # columns, un-concatenate the batch, restore NCHW.
    out = out.reshape(grid_n, O, block_n, hf_p)[:, :, :, :Hf]
    out = jnp.transpose(out, (0, 2, 1, 3)).reshape(n_pad, O, Hf)[:N]
    return out[..., None]                                   # (N, O, Hf, 1)


# ----------------------------------------------------------------------------
# Pure-JAX reference (same math, XLA ops) for a correctness check.
# ----------------------------------------------------------------------------
def _reference_forward(source, focus, params, *, kernel_size):
    kh, _ = kernel_size
    pad = kh // 2
    N, C, Hs, _ = source.shape
    Hf = focus.shape[2]
    src = jnp.transpose(source[:, :, :, 0], (0, 2, 1))
    foc = jnp.transpose(focus[:, :, :, 0], (0, 2, 1))
    srcp = jnp.pad(src, ((0, 0), (pad, pad), (0, 0)))
    focp = jnp.pad(foc, ((0, 0), (pad, pad), (0, 0)))

    def conv_h(xpad, h, w, bias):                      # w: (O', C, kh, 1)
        w_ = w[:, :, :, 0]
        out = sum(jnp.einsum('nhc,oc->nho', xpad[:, d:d + h, :], w_[:, :, d])
                  for d in range(kh))
        return out + bias

    def conv1x1(x, w, bias):                           # w: (O', C, 1, 1)
        return jnp.einsum('nhc,oc->nho', x, w[:, :, 0, 0]) + bias

    s_src = (jnp.tanh(conv_h(srcp, Hs, params['conv_tri_source.weight'], params['conv_tri_source.bias']))
             * jax.nn.sigmoid(conv_h(srcp, Hs, params['gate_tri_source.weight'], params['gate_tri_source.bias']))
             + jnp.tanh(conv1x1(src, params['conv_uni_source.weight'], params['conv_uni_source.bias']))
             * jax.nn.sigmoid(conv1x1(src, params['gate_uni_source.weight'], params['gate_uni_source.bias'])))
    s_foc = (jnp.tanh(conv_h(focp, Hf, params['conv_tri_foci.weight'], params['conv_tri_foci.bias']))
             * jax.nn.sigmoid(conv_h(focp, Hf, params['gate_tri_foci.weight'], params['gate_tri_foci.bias']))
             + jnp.tanh(conv1x1(foc, params['conv_uni_foci.weight'], params['conv_uni_foci.bias']))
             * jax.nn.sigmoid(conv1x1(foc, params['gate_uni_foci.weight'], params['gate_uni_foci.bias'])))

    energy = jnp.einsum('nio,njo->nij', s_foc, s_src)
    m = jnp.max(energy, axis=-1, keepdims=True)
    p = jnp.exp(energy - m)
    attn = p / jnp.sum(p, axis=-1, keepdims=True)
    context = jnp.einsum('nij,njc->nic', attn, src)

    y = conv_h(focp, Hf, params['conv.weight'], 0.0)
    fused = jnp.concatenate([context, foc], axis=-1)
    z = jnp.einsum('nic,oc->nio', fused, params['context_conv.weight'][:, :, 0]) \
        + params['context_conv.bias']
    out = jnp.tanh(y + z)
    return jnp.transpose(out, (0, 2, 1))[..., None]


# ----------------------------------------------------------------------------
# Deterministic parameter init (shapes exactly as BaseAttentiveConv2d.__init__,
# source_reweight=False, kernel_size=(kh, 1)).
# ----------------------------------------------------------------------------
def init_params(key, in_channels, out_channels, kh):
    names_tri = ['conv_tri_source', 'conv_tri_foci', 'gate_tri_source', 'gate_tri_foci']
    names_uni = ['conv_uni_source', 'conv_uni_foci', 'gate_uni_source', 'gate_uni_foci']
    keys = iter(jax.random.split(key, 4 * len(names_tri + names_uni) + 8))

    def rnd(shape, scale=0.4):
        return scale * jax.random.normal(next(keys), shape, jnp.float32)

    p = {}
    for name in names_tri:
        p[name + '.weight'] = rnd((1, in_channels, kh, 1))
        p[name + '.bias'] = rnd((1,))
    for name in names_uni:
        p[name + '.weight'] = rnd((1, in_channels, 1, 1))
        p[name + '.bias'] = rnd((1,))
    p['conv.weight'] = rnd((out_channels, in_channels, kh, 1))        # bias=False
    p['context_conv.weight'] = rnd((out_channels, 2 * in_channels, 1))
    p['context_conv.bias'] = rnd((out_channels,))
    return p


if __name__ == "__main__":
    key = jax.random.PRNGKey(0)
    k_src, k_foc, k_par = jax.random.split(key, 3)

    N, C, O = 4, 8, 4          # batch, in_channels (embedding dim), out_channels
    Hs, Hf = 16, 12            # source / focus sequence lengths
    kernel_size = (3, 1)       # (kh, kw)

    source = jax.random.normal(k_src, (N, C, Hs, 1), jnp.float32)
    focus = jax.random.normal(k_foc, (N, C, Hf, 1), jnp.float32)
    params = init_params(k_par, C, O, kernel_size[0])

    ref = _reference_forward(source, focus, params, kernel_size=kernel_size)

    # f32 MXU operands: tight check against the XLA reference (tolerance covers
    # the EUP approximate reciprocal in the softmax).
    out_f32 = attentive_conv2d_forward(source, focus, params, kernel_size=kernel_size,
                                       compute_dtype=jnp.float32)
    out_f32 = jax.block_until_ready(out_f32)
    assert out_f32.shape == (N, O, Hf, 1), out_f32.shape
    assert jnp.allclose(out_f32, ref, atol=2e-2, rtol=2e-2), \
        float(jnp.max(jnp.abs(out_f32 - ref)))

    # bf16 scoring matmuls (default fast path); attention probabilities and the
    # context / output matmuls stay in f32.
    out_bf16 = attentive_conv2d_forward(source, focus, params, kernel_size=kernel_size,
                                        compute_dtype=jnp.bfloat16)
    out_bf16 = jax.block_until_ready(out_bf16)
    assert out_bf16.shape == (N, O, Hf, 1), out_bf16.shape
    assert jnp.allclose(out_bf16, ref, atol=1.5e-1), \
        float(jnp.max(jnp.abs(out_bf16 - ref)))

    # Exercise the padded-batch path (N not a multiple of block_n).
    out_pad = attentive_conv2d_forward(source[:3], focus[:3], params,
                                       kernel_size=kernel_size,
                                       compute_dtype=jnp.float32, block_n=2)
    out_pad = jax.block_until_ready(out_pad)
    assert out_pad.shape == (3, O, Hf, 1), out_pad.shape
    assert jnp.allclose(out_pad, ref[:3], atol=2e-2, rtol=2e-2), \
        float(jnp.max(jnp.abs(out_pad - ref[:3])))

    print("KERNEL_OK")
</pallas_src>

<mosaic_0001>
module attributes {stable_mosaic.version = 11 : i64} {
  func.func @_attentive_conv_kernel(%arg0: i32, %arg1: memref<4x8x16xf32, #tpu.memory_space<vmem>>, %arg2: memref<4x8x12xf32, #tpu.memory_space<vmem>>, %arg3: memref<8x8xf32, #tpu.memory_space<vmem>>, %arg4: memref<8x8xf32, #tpu.memory_space<vmem>>, %arg5: memref<8xf32, #tpu.memory_space<smem>>, %arg6: memref<4x32xf32, #tpu.memory_space<vmem>>, %arg7: memref<4x1xf32, #tpu.memory_space<vmem>>, %arg8: memref<1x4x56xf32, #tpu.memory_space<vmem>>, %arg9: memref<8x74xf32, #tpu.memory_space<vmem>>, %arg10: memref<8x58xf32, #tpu.memory_space<vmem>>, %arg11: memref<32x56xf32, #tpu.memory_space<vmem>>) attributes {dimension_semantics = [#tpu.dimension_semantics<parallel>], iteration_bounds = array<i64: 1>, scalar_prefetch = 0 : i64, scratch_operands = 3 : i64, tpu.core_type = #tpu.core_type<tc>, window_params = [{transform_indices = @transform_0, window_bounds = array<i64: 4, 8, 16>}, {transform_indices = @transform_1, window_bounds = array<i64: 4, 8, 12>}, {pipeline_mode = #tpu.pipeline_mode<synchronous>, transform_indices = @transform_2, window_bounds = array<i64: 8, 8>}, {pipeline_mode = #tpu.pipeline_mode<synchronous>, transform_indices = @transform_3, window_bounds = array<i64: 8, 8>}, {transform_indices = @transform_4, window_bounds = array<i64: 8>}, {pipeline_mode = #tpu.pipeline_mode<synchronous>, transform_indices = @transform_5, window_bounds = array<i64: 4, 32>}, {pipeline_mode = #tpu.pipeline_mode<synchronous>, transform_indices = @transform_6, window_bounds = array<i64: 4, 1>}, {transform_indices = @transform_7, window_bounds = array<i64: 1, 4, 56>}]} {
    %cst = arith.constant 0.000000e+00 : f32
    %0 = vector.broadcast %cst : f32 to vector<8x74xf32>
    %c0 = arith.constant 0 : index
    %c0_0 = arith.constant 0 : index
    %1 = vector.load %arg9[%c0, %c0_0] : memref<8x74xf32, #tpu.memory_space<vmem>>, vector<8x74xf32>
    tpu.vector_store %arg9[%c0, %c0_0], %0 {strides = array<i32>} : memref<8x74xf32, #tpu.memory_space<vmem>>, vector<8x74xf32>,
    %cst_1 = arith.constant 0.000000e+00 : f32
    %2 = vector.broadcast %cst_1 : f32 to vector<8x58xf32>
    %c0_2 = arith.constant 0 : index
    %c0_3 = arith.constant 0 : index
    %3 = vector.load %arg10[%c0_2, %c0_3] : memref<8x58xf32, #tpu.memory_space<vmem>>, vector<8x58xf32>
    tpu.vector_store %arg10[%c0_2, %c0_3], %2 {strides = array<i32>} : memref<8x58xf32, #tpu.memory_space<vmem>>, vector<8x58xf32>,
    %c0_4 = arith.constant 0 : index
    %c0_5 = arith.constant 0 : index
    %c0_6 = arith.constant 0 : index
    %4 = vector.load %arg1[%c0_4, %c0_5, %c0_6] : memref<4x8x16xf32, #tpu.memory_space<vmem>>, vector<1x8x16xf32>
    %5 = vector.shape_cast %4 : vector<1x8x16xf32> to vector<8x16xf32>
    %c0_7 = arith.constant 0 : index
    %c1 = arith.constant 1 : index
    %6 = vector.load %arg9[%c0_7, %c1] : memref<8x74xf32, #tpu.memory_space<vmem>>, vector<8x16xf32>
    tpu.vector_store %arg9[%c0_7, %c1], %5 {strides = array<i32>} : memref<8x74xf32, #tpu.memory_space<vmem>>, vector<8x16xf32>,
    %c0_8 = arith.constant 0 : index
    %c0_9 = arith.constant 0 : index
    %c0_10 = arith.constant 0 : index
    %7 = vector.load %arg2[%c0_8, %c0_9, %c0_10] : memref<4x8x12xf32, #tpu.memory_space<vmem>>, vector<1x8x12xf32>
    %8 = vector.shape_cast %7 : vector<1x8x12xf32> to vector<8x12xf32>
    %c0_11 = arith.constant 0 : index
    %c1_12 = arith.constant 1 : index
    %9 = vector.load %arg10[%c0_11, %c1_12] : memref<8x58xf32, #tpu.memory_space<vmem>>, vector<8x12xf32>
    tpu.vector_store %arg10[%c0_11, %c1_12], %8 {strides = array<i32>} : memref<8x58xf32, #tpu.memory_space<vmem>>, vector<8x12xf32>,
    %c1_13 = arith.constant 1 : index
    %c0_14 = arith.constant 0 : index
    %c0_15 = arith.constant 0 : index
    %10 = vector.load %arg1[%c1_13, %c0_14, %c0_15] : memref<4x8x16xf32, #tpu.memory_space<vmem>>, vector<1x8x16xf32>
    %11 = vector.shape_cast %10 : vector<1x8x16xf32> to vector<8x16xf32>
    %c0_16 = arith.constant 0 : index
    %c19 = arith.constant 19 : index
    %12 = vector.load %arg9[%c0_16, %c19] : memref<8x74xf32, #tpu.memory_space<vmem>>, vector<8x16xf32>
    tpu.vector_store %arg9[%c0_16, %c19], %11 {strides = array<i32>} : memref<8x74xf32, #tpu.memory_space<vmem>>, vector<8x16xf32>,
    %c1_17 = arith.constant 1 : index
    %c0_18 = arith.constant 0 : index
    %c0_19 = arith.constant 0 : index
    %13 = vector.load %arg2[%c1_17, %c0_18, %c0_19] : memref<4x8x12xf32, #tpu.memory_space<vmem>>, vector<1x8x12xf32>
    %14 = vector.shape_cast %13 : vector<1x8x12xf32> to vector<8x12xf32>
    %c0_20 = arith.constant 0 : index
    %c15 = arith.constant 15 : index
    %15 = vector.load %arg10[%c0_20, %c15] : memref<8x58xf32, #tpu.memory_space<vmem>>, vector<8x12xf32>
    tpu.vector_store %arg10[%c0_20, %c15], %14 {strides = array<i32>} : memref<8x58xf32, #tpu.memory_space<vmem>>, vector<8x12xf32>,
    %c2 = arith.constant 2 : index
    %c0_21 = arith.constant 0 : index
    %c0_22 = arith.constant 0 : index
    %16 = vector.load %arg1[%c2, %c0_21, %c0_22] : memref<4x8x16xf32, #tpu.memory_space<vmem>>, vector<1x8x16xf32>
    %17 = vector.shape_cast %16 : vector<1x8x16xf32> to vector<8x16xf32>
    %c0_23 = arith.constant 0 : index
    %c37 = arith.constant 37 : index
    %18 = vector.load %arg9[%c0_23, %c37] : memref<8x74xf32, #tpu.memory_space<vmem>>, vector<8x16xf32>
    tpu.vector_store %arg9[%c0_23, %c37], %17 {strides = array<i32>} : memref<8x74xf32, #tpu.memory_space<vmem>>, vector<8x16xf32>,
    %c2_24 = arith.constant 2 : index
    %c0_25 = arith.constant 0 : index
    %c0_26 = arith.constant 0 : index
    %19 = vector.load %arg2[%c2_24, %c0_25, %c0_26] : memref<4x8x12xf32, #tpu.memory_space<vmem>>, vector<1x8x12xf32>
    %20 = vector.shape_cast %19 : vector<1x8x12xf32> to vector<8x12xf32>
    %c0_27 = arith.constant 0 : index
    %c29 = arith.constant 29 : index
    %21 = vector.load %arg10[%c0_27, %c29] : memref<8x58xf32, #tpu.memory_space<vmem>>, vector<8x12xf32>
    tpu.vector_store %arg10[%c0_27, %c29], %20 {strides = array<i32>} : memref<8x58xf32, #tpu.memory_space<vmem>>, vector<8x12xf32>,
    %c3 = arith.constant 3 : index
    %c0_28 = arith.constant 0 : index
    %c0_29 = arith.constant 0 : index
    %22 = vector.load %arg1[%c3, %c0_28, %c0_29] : memref<4x8x16xf32, #tpu.memory_space<vmem>>, vector<1x8x16xf32>
    %23 = vector.shape_cast %22 : vector<1x8x16xf32> to vector<8x16xf32>
    %c0_30 = arith.constant 0 : index
    %c55 = arith.constant 55 : index
    %24 = vector.load %arg9[%c0_30, %c55] : memref<8x74xf32, #tpu.memory_space<vmem>>, vector<8x16xf32>
    tpu.vector_store %arg9[%c0_30, %c55], %23 {strides = array<i32>} : memref<8x74xf32, #tpu.memory_space<vmem>>, vector<8x16xf32>,
    %c3_31 = arith.constant 3 : index
    %c0_32 = arith.constant 0 : index
    %c0_33 = arith.constant 0 : index
    %25 = vector.load %arg2[%c3_31, %c0_32, %c0_33] : memref<4x8x12xf32, #tpu.memory_space<vmem>>, vector<1x8x12xf32>
    %26 = vector.shape_cast %25 : vector<1x8x12xf32> to vector<8x12xf32>
    %c0_34 = arith.constant 0 : index
    %c43 = arith.constant 43 : index
    %27 = vector.load %arg10[%c0_34, %c43] : memref<8x58xf32, #tpu.memory_space<vmem>>, vector<8x12xf32>
    tpu.vector_store %arg10[%c0_34, %c43], %26 {strides = array<i32>} : memref<8x58xf32, #tpu.memory_space<vmem>>, vector<8x12xf32>,
    %c0_35 = arith.constant 0 : index
    %c0_36 = arith.constant 0 : index
    %28 = vector.load %arg3[%c0_35, %c0_36] : memref<8x8xf32, #tpu.memory_space<vmem>>, vector<8x8xf32>
    %c0_37 = arith.constant 0 : index
    %c0_38 = arith.constant 0 : index
    %29 = vector.load %arg9[%c0_37, %c0_38] : memref<8x74xf32, #tpu.memory_space<vmem>>, vector<8x74xf32>
    %cst_39 = arith.constant dense<0.000000e+00> : vector<8x74xf32>
    %30 = tpu.matmul %28, %29, %cst_39 {dimension_numbers = #tpu.dot_dimension_numbers<[1], [0], [0], [1], [0, 0, 1, 1], [], []>} : vector<8x8xf32>, vector<8x74xf32>, vector<8x74xf32> -> vector<8x74xf32>
    %c0_40 = arith.constant 0 : index
    %c0_41 = arith.constant 0 : index
    %31 = vector.load %arg4[%c0_40, %c0_41] : memref<8x8xf32, #tpu.memory_space<vmem>>, vector<8x8xf32>
    %c0_42 = arith.constant 0 : index
    %c0_43 = arith.constant 0 : index
    %32 = vector.load %arg10[%c0_42, %c0_43] : memref<8x58xf32, #tpu.memory_space<vmem>>, vector<8x58xf32>
    %cst_44 = arith.constant dense<0.000000e+00> : vector<8x58xf32>
    %33 = tpu.matmul %31, %32, %cst_44 {dimension_numbers = #tpu.dot_dimension_numbers<[1], [0], [0], [1], [0, 0, 1, 1], [], []>} : vector<8x8xf32>, vector<8x58xf32>, vector<8x58xf32> -> vector<8x58xf32>
    %34 = vector.extract_strided_slice %30 {offsets = [0, 0], sizes = [1, 72], strides = [1, 1]} : vector<8x74xf32> to vector<1x72xf32>
    %35 = vector.extract_strided_slice %30 {offsets = [3, 0], sizes = [1, 72], strides = [1, 1]} : vector<8x74xf32> to vector<1x72xf32>
    %36 = vector.extract_strided_slice %30 {offsets = [1, 1], sizes = [1, 72], strides = [1, 1]} : vector<8x74xf32> to vector<1x72xf32>
    %37 = arith.addf %34, %36 : vector<1x72xf32>
    %38 = vector.extract_strided_slice %30 {offsets = [4, 1], sizes = [1, 72], strides = [1, 1]} : vector<8x74xf32> to vector<1x72xf32>
    %39 = arith.addf %35, %38 : vector<1x72xf32>
    %40 = vector.extract_strided_slice %30 {offsets = [2, 2], sizes = [1, 72], strides = [1, 1]} : vector<8x74xf32> to vector<1x72xf32>
    %41 = arith.addf %37, %40 : vector<1x72xf32>
    %42 = vector.extract_strided_slice %30 {offsets = [5, 2], sizes = [1, 72], strides = [1, 1]} : vector<8x74xf32> to vector<1x72xf32>
    %43 = arith.addf %39, %42 : vector<1x72xf32>
    %c0_45 = arith.constant 0 : index
    %44 = memref.load %arg5[%c0_45] : memref<8xf32, #tpu.memory_space<smem>>
    %45 = vector.broadcast %44 : f32 to vector<1x72xf32>
    %46 = arith.addf %41, %45 : vector<1x72xf32>
    %c1_46 = arith.constant 1 : index
    %47 = memref.load %arg5[%c1_46] : memref<8xf32, #tpu.memory_space<smem>>
    %48 = vector.broadcast %47 : f32 to vector<1x72xf32>
    %49 = arith.addf %43, %48 : vector<1x72xf32>
    %50 = vector.extract_strided_slice %30 {offsets = [6, 1], sizes = [1, 72], strides = [1, 1]} : vector<8x74xf32> to vector<1x72xf32>
    %c2_47 = arith.constant 2 : index
    %51 = memref.load %arg5[%c2_47] : memref<8xf32, #tpu.memory_space<smem>>
    %52 = vector.broadcast %51 : f32 to vector<1x72xf32>
    %53 = arith.addf %50, %52 : vector<1x72xf32>
    %54 = vector.extract_strided_slice %30 {offsets = [7, 1], sizes = [1, 72], strides = [1, 1]} : vector<8x74xf32> to vector<1x72xf32>
    %c3_48 = arith.constant 3 : index
    %55 = memref.load %arg5[%c3_48] : memref<8xf32, #tpu.memory_space<smem>>
    %56 = vector.broadcast %55 : f32 to vector<1x72xf32>
    %57 = arith.addf %54, %56 : vector<1x72xf32>
    %58 = math.tanh %46 : vector<1x72xf32>
    %59 = arith.negf %49 : vector<1x72xf32>
    %60 = math.exp %59 : vector<1x72xf32>
    %cst_49 = arith.constant 1.000000e+00 : f32
    %61 = vector.broadcast %cst_49 : f32 to vector<1x72xf32>
    %62 = arith.addf %61, %60 : vector<1x72xf32>
    %63 = arith.divf %61, %62 : vector<1x72xf32>
    %64 = arith.mulf %58, %63 : vector<1x72xf32>
    %65 = math.tanh %53 : vector<1x72xf32>
    %66 = arith.negf %57 : vector<1x72xf32>
    %67 = math.exp %66 : vector<1x72xf32>
    %cst_50 = arith.constant 1.000000e+00 : f32
    %68 = vector.broadcast %cst_50 : f32 to vector<1x72xf32>
    %69 = arith.addf %68, %67 : vector<1x72xf32>
    %70 = arith.divf %68, %69 : vector<1x72xf32>
    %71 = arith.mulf %65, %70 : vector<1x72xf32>
    %72 = arith.addf %64, %71 : vector<1x72xf32>
    %73 = vector.extract_strided_slice %33 {offsets = [0, 0], sizes = [1, 56], strides = [1, 1]} : vector<8x58xf32> to vector<1x56xf32>
    %74 = vector.extract_strided_slice %33 {offsets = [3, 0], sizes = [1, 56], strides = [1, 1]} : vector<8x58xf32> to vector<1x56xf32>
    %75 = vector.extract_strided_slice %33 {offsets = [1, 1], sizes = [1, 56], strides = [1, 1]} : vector<8x58xf32> to vector<1x56xf32>
    %76 = arith.addf %73, %75 : vector<1x56xf32>
    %77 = vector.extract_strided_slice %33 {offsets = [4, 1], sizes = [1, 56], strides = [1, 1]} : vector<8x58xf32> to vector<1x56xf32>
    %78 = arith.addf %74, %77 : vector<1x56xf32>
    %79 = vector.extract_strided_slice %33 {offsets = [2, 2], sizes = [1, 56], strides = [1, 1]} : vector<8x58xf32> to vector<1x56xf32>
    %80 = arith.addf %76, %79 : vector<1x56xf32>
    %81 = vector.extract_strided_slice %33 {offsets = [5, 2], sizes = [1, 56], strides = [1, 1]} : vector<8x58xf32> to vector<1x56xf32>
    %82 = arith.addf %78, %81 : vector<1x56xf32>
    %c4 = arith.constant 4 : index
    %83 = memref.load %arg5[%c4] : memref<8xf32, #tpu.memory_space<smem>>
    %84 = vector.broadcast %83 : f32 to vector<1x56xf32>
    %85 = arith.addf %80, %84 : vector<1x56xf32>
    %c5 = arith.constant 5 : index
    %86 = memref.load %arg5[%c5] : memref<8xf32, #tpu.memory_space<smem>>
    %87 = vector.broadcast %86 : f32 to vector<1x56xf32>
    %88 = arith.addf %82, %87 : vector<1x56xf32>
    %89 = vector.extract_strided_slice %33 {offsets = [6, 1], sizes = [1, 56], strides = [1, 1]} : vector<8x58xf32> to vector<1x56xf32>
    %c6 = arith.constant 6 : index
    %90 = memref.load %arg5[%c6] : memref<8xf32, #tpu.memory_space<smem>>
    %91 = vector.broadcast %90 : f32 to vector<1x56xf32>
    %92 = arith.addf %89, %91 : vector<1x56xf32>
    %93 = vector.extract_strided_slice %33 {offsets = [7, 1], sizes = [1, 56], strides = [1, 1]} : vector<8x58xf32> to vector<1x56xf32>
    %c7 = arith.constant 7 : index
    %94 = memref.load %arg5[%c7] : memref<8xf32, #tpu.memory_space<smem>>
    %95 = vector.broadcast %94 : f32 to vector<1x56xf32>
    %96 = arith.addf %93, %95 : vector<1x56xf32>
    %97 = math.tanh %85 : vector<1x56xf32>
    %98 = arith.negf %88 : vector<1x56xf32>
    %99 = math.exp %98 : vector<1x56xf32>
    %cst_51 = arith.constant 1.000000e+00 : f32
    %100 = vector.broadcast %cst_51 : f32 to vector<1x56xf32>
    %101 = arith.addf %100, %99 : vector<1x56xf32>
    %102 = arith.divf %100, %101 : vector<1x56xf32>
    %103 = arith.mulf %97, %102 : vector<1x56xf32>
    %104 = math.tanh %92 : vector<1x56xf32>
    %105 = arith.negf %96 : vector<1x56xf32>
    %106 = math.exp %105 : vector<1x56xf32>
    %cst_52 = arith.constant 1.000000e+00 : f32
    %107 = vector.broadcast %cst_52 : f32 to vector<1x56xf32>
    %108 = arith.addf %107, %106 : vector<1x56xf32>
    %109 = arith.divf %107, %108 : vector<1x56xf32>
    %110 = arith.mulf %104, %109 : vector<1x56xf32>
    %111 = arith.addf %103, %110 : vector<1x56xf32>
    %c0_53 = arith.constant 0 : index
    %c0_54 = arith.constant 0 : index
    %112 = vector.load %arg10[%c0_53, %c0_54] : memref<8x58xf32, #tpu.memory_space<vmem>>, vector<8x56xf32>
    %c0_55 = arith.constant 0 : index
    %c0_56 = arith.constant 0 : index
    %113 = vector.load %arg11[%c0_55, %c0_56] : memref<32x56xf32, #tpu.memory_space<vmem>>, vector<8x56xf32>
    tpu.vector_store %arg11[%c0_55, %c0_56], %112 {strides = array<i32>} : memref<32x56xf32, #tpu.memory_space<vmem>>, vector<8x56xf32>,
    %c0_57 = arith.constant 0 : index
    %c1_58 = arith.constant 1 : index
    %114 = vector.load %arg10[%c0_57, %c1_58] : memref<8x58xf32, #tpu.memory_space<vmem>>, vector<8x56xf32>
    %c8 = arith.constant 8 : index
    %c0_59 = arith.constant 0 : index
    %115 = vector.load %arg11[%c8, %c0_59] : memref<32x56xf32, #tpu.memory_space<vmem>>, vector<8x56xf32>
    tpu.vector_store %arg11[%c8, %c0_59], %114 {strides = array<i32>} : memref<32x56xf32, #tpu.memory_space<vmem>>, vector<8x56xf32>,
    %c0_60 = arith.constant 0 : index
    %c2_61 = arith.constant 2 : index
    %116 = vector.load %arg10[%c0_60, %c2_61] : memref<8x58xf32, #tpu.memory_space<vmem>>, vector<8x56xf32>
    %c16 = arith.constant 16 : index
    %c0_62 = arith.constant 0 : index
    %117 = vector.load %arg11[%c16, %c0_62] : memref<32x56xf32, #tpu.memory_space<vmem>>, vector<8x56xf32>
    tpu.vector_store %arg11[%c16, %c0_62], %116 {strides = array<i32>} : memref<32x56xf32, #tpu.memory_space<vmem>>, vector<8x56xf32>,
    %cst_63 = arith.constant 0.000000e+00 : f32
    %118 = vector.broadcast %cst_63 : f32 to vector<8x56xf32>
    %c24 = arith.constant 24 : index
    %c0_64 = arith.constant 0 : index
    %119 = vector.load %arg11[%c24, %c0_64] : memref<32x56xf32, #tpu.memory_space<vmem>>, vector<8x56xf32>
    tpu.vector_store %arg11[%c24, %c0_64], %118 {strides = array<i32>} : memref<32x56xf32, #tpu.memory_space<vmem>>, vector<8x56xf32>,
    %120 = tpu.iota {dimensions = array<i32: 0>} : vector<16x16xi32>
    %121 = tpu.iota {dimensions = array<i32: 1>} : vector<16x16xi32>
    %122 = arith.cmpi eq, %120, %121 : vector<16x16xi32>
    %123 = vector.extract_strided_slice %72 {offsets = [0, 0], sizes = [1, 16], strides = [1, 1]} : vector<1x72xf32> to vector<1x16xf32>
    %124 = vector.extract_strided_slice %111 {offsets = [0, 0], sizes = [1, 12], strides = [1, 1]} : vector<1x56xf32> to vector<1x12xf32>
    %cst_65 = arith.constant 0.000000e+00 : f32
    %125 = vector.shape_cast %123 : vector<1x16xf32> to vector<1x16xf32>
    %126 = vector.broadcast %125 : vector<1x16xf32> to vector<16x16xf32>
    %127 = vector.broadcast %cst_65 : f32 to vector<16x16xf32>
    %128 = arith.select %122, %126, %127 : vector<16x16xi1>, vector<16x16xf32>
    %cst_66 = arith.constant dense<0.000000e+00> : vector<16xf32>
    %129 = vector.multi_reduction <add>, %128, %cst_66 [1] : vector<16x16xf32> to vector<16xf32>
    %130 = vector.shape_cast %129 : vector<16xf32> to vector<16x1xf32>
    %131 = vector.broadcast %130 : vector<16x1xf32> to vector<16x12xf32>
    %132 = vector.broadcast %124 : vector<1x12xf32> to vector<16x12xf32>
    %133 = arith.mulf %131, %132 : vector<16x12xf32>
    %cst_67 = arith.constant dense<0xFF800000> : vector<12xf32>
    %134 = vector.multi_reduction <maximumf>, %133, %cst_67 [0] : vector<16x12xf32> to vector<12xf32>
    %135 = vector.shape_cast %134 : vector<12xf32> to vector<1x12xf32>
    %136 = vector.broadcast %135 : vector<1x12xf32> to vector<16x12xf32>
    %137 = arith.subf %133, %136 : vector<16x12xf32>
    %138 = math.exp %137 : vector<16x12xf32>
    %cst_68 = arith.constant dense<0.000000e+00> : vector<12xf32>
    %139 = vector.multi_reduction <add>, %138, %cst_68 [0] : vector<16x12xf32> to vector<12xf32>
    %140 = vector.shape_cast %139 : vector<12xf32> to vector<1x12xf32>
    %141 = tpu.reciprocal %140 {approx = true} : vector<1x12xf32> -> vector<1x12xf32>
    %142 = vector.broadcast %141 : vector<1x12xf32> to vector<16x12xf32>
    %143 = arith.mulf %138, %142 : vector<16x12xf32>
    %c0_69 = arith.constant 0 : index
    %c1_70 = arith.constant 1 : index
    %144 = vector.load %arg9[%c0_69, %c1_70] : memref<8x74xf32, #tpu.memory_space<vmem>>, vector<8x16xf32>
    %cst_71 = arith.constant dense<0.000000e+00> : vector<8x12xf32>
    %145 = tpu.matmul %144, %143, %cst_71 {dimension_numbers = #tpu.dot_dimension_numbers<[1], [0], [0], [1], [0, 0, 1, 1], [], []>} : vector<8x16xf32>, vector<16x12xf32>, vector<8x12xf32> -> vector<8x12xf32>
    %c24_72 = arith.constant 24 : index
    %c0_73 = arith.constant 0 : index
    %146 = vector.load %arg11[%c24_72, %c0_73] : memref<32x56xf32, #tpu.memory_space<vmem>>, vector<8x12xf32>
    tpu.vector_store %arg11[%c24_72, %c0_73], %145 {strides = array<i32>} : memref<32x56xf32, #tpu.memory_space<vmem>>, vector<8x12xf32>,
    %147 = vector.extract_strided_slice %72 {offsets = [0, 18], sizes = [1, 16], strides = [1, 1]} : vector<1x72xf32> to vector<1x16xf32>
    %148 = vector.extract_strided_slice %111 {offsets = [0, 14], sizes = [1, 12], strides = [1, 1]} : vector<1x56xf32> to vector<1x12xf32>
    %cst_74 = arith.constant 0.000000e+00 : f32
    %149 = vector.shape_cast %147 : vector<1x16xf32> to vector<1x16xf32>
    %150 = vector.broadcast %149 : vector<1x16xf32> to vector<16x16xf32>
    %151 = vector.broadcast %cst_74 : f32 to vector<16x16xf32>
    %152 = arith.select %122, %150, %151 : vector<16x16xi1>, vector<16x16xf32>
    %cst_75 = arith.constant dense<0.000000e+00> : vector<16xf32>
    %153 = vector.multi_reduction <add>, %152, %cst_75 [1] : vector<16x16xf32> to vector<16xf32>
    %154 = vector.shape_cast %153 : vector<16xf32> to vector<16x1xf32>
    %155 = vector.broadcast %154 : vector<16x1xf32> to vector<16x12xf32>
    %156 = vector.broadcast %148 : vector<1x12xf32> to vector<16x12xf32>
    %157 = arith.mulf %155, %156 : vector<16x12xf32>
    %cst_76 = arith.constant dense<0xFF800000> : vector<12xf32>
    %158 = vector.multi_reduction <maximumf>, %157, %cst_76 [0] : vector<16x12xf32> to vector<12xf32>
    %159 = vector.shape_cast %158 : vector<12xf32> to vector<1x12xf32>
    %160 = vector.broadcast %159 : vector<1x12xf32> to vector<16x12xf32>
    %161 = arith.subf %157, %160 : vector<16x12xf32>
    %162 = math.exp %161 : vector<16x12xf32>
    %cst_77 = arith.constant dense<0.000000e+00> : vector<12xf32>
    %163 = vector.multi_reduction <add>, %162, %cst_77 [0] : vector<16x12xf32> to vector<12xf32>
    %164 = vector.shape_cast %163 : vector<12xf32> to vector<1x12xf32>
    %165 = tpu.reciprocal %164 {approx = true} : vector<1x12xf32> -> vector<1x12xf32>
    %166 = vector.broadcast %165 : vector<1x12xf32> to vector<16x12xf32>
    %167 = arith.mulf %162, %166 : vector<16x12xf32>
    %c0_78 = arith.constant 0 : index
    %c19_79 = arith.constant 19 : index
    %168 = vector.load %arg9[%c0_78, %c19_79] : memref<8x74xf32, #tpu.memory_space<vmem>>, vector<8x16xf32>
    %cst_80 = arith.constant dense<0.000000e+00> : vector<8x12xf32>
    %169 = tpu.matmul %168, %167, %cst_80 {dimension_numbers = #tpu.dot_dimension_numbers<[1], [0], [0], [1], [0, 0, 1, 1], [], []>} : vector<8x16xf32>, vector<16x12xf32>, vector<8x12xf32> -> vector<8x12xf32>
    %c24_81 = arith.constant 24 : index
    %c14 = arith.constant 14 : index
    %170 = vector.load %arg11[%c24_81, %c14] : memref<32x56xf32, #tpu.memory_space<vmem>>, vector<8x12xf32>
    tpu.vector_store %arg11[%c24_81, %c14], %169 {strides = array<i32>} : memref<32x56xf32, #tpu.memory_space<vmem>>, vector<8x12xf32>,
    %171 = vector.extract_strided_slice %72 {offsets = [0, 36], sizes = [1, 16], strides = [1, 1]} : vector<1x72xf32> to vector<1x16xf32>
    %172 = vector.extract_strided_slice %111 {offsets = [0, 28], sizes = [1, 12], strides = [1, 1]} : vector<1x56xf32> to vector<1x12xf32>
    %cst_82 = arith.constant 0.000000e+00 : f32
    %173 = vector.shape_cast %171 : vector<1x16xf32> to vector<1x16xf32>
    %174 = vector.broadcast %173 : vector<1x16xf32> to vector<16x16xf32>
    %175 = vector.broadcast %cst_82 : f32 to vector<16x16xf32>
    %176 = arith.select %122, %174, %175 : vector<16x16xi1>, vector<16x16xf32>
    %cst_83 = arith.constant dense<0.000000e+00> : vector<16xf32>
    %177 = vector.multi_reduction <add>, %176, %cst_83 [1] : vector<16x16xf32> to vector<16xf32>
    %178 = vector.shape_cast %177 : vector<16xf32> to vector<16x1xf32>
    %179 = vector.broadcast %178 : vector<16x1xf32> to vector<16x12xf32>
    %180 = vector.broadcast %172 : vector<1x12xf32> to vector<16x12xf32>
    %181 = arith.mulf %179, %180 : vector<16x12xf32>
    %cst_84 = arith.constant dense<0xFF800000> : vector<12xf32>
    %182 = vector.multi_reduction <maximumf>, %181, %cst_84 [0] : vector<16x12xf32> to vector<12xf32>
    %183 = vector.shape_cast %182 : vector<12xf32> to vector<1x12xf32>
    %184 = vector.broadcast %183 : vector<1x12xf32> to vector<16x12xf32>
    %185 = arith.subf %181, %184 : vector<16x12xf32>
    %186 = math.exp %185 : vector<16x12xf32>
    %cst_85 = arith.constant dense<0.000000e+00> : vector<12xf32>
    %187 = vector.multi_reduction <add>, %186, %cst_85 [0] : vector<16x12xf32> to vector<12xf32>
    %188 = vector.shape_cast %187 : vector<12xf32> to vector<1x12xf32>
    %189 = tpu.reciprocal %188 {approx = true} : vector<1x12xf32> -> vector<1x12xf32>
    %190 = vector.broadcast %189 : vector<1x12xf32> to vector<16x12xf32>
    %191 = arith.mulf %186, %190 : vector<16x12xf32>
    %c0_86 = arith.constant 0 : index
    %c37_87 = arith.constant 37 : index
    %192 = vector.load %arg9[%c0_86, %c37_87] : memref<8x74xf32, #tpu.memory_space<vmem>>, vector<8x16xf32>
    %cst_88 = arith.constant dense<0.000000e+00> : vector<8x12xf32>
    %193 = tpu.matmul %192, %191, %cst_88 {dimension_numbers = #tpu.dot_dimension_numbers<[1], [0], [0], [1], [0, 0, 1, 1], [], []>} : vector<8x16xf32>, vector<16x12xf32>, vector<8x12xf32> -> vector<8x12xf32>
    %c24_89 = arith.constant 24 : index
    %c28 = arith.constant 28 : index
    %194 = vector.load %arg11[%c24_89, %c28] : memref<32x56xf32, #tpu.memory_space<vmem>>, vector<8x12xf32>
    tpu.vector_store %arg11[%c24_89, %c28], %193 {strides = array<i32>} : memref<32x56xf32, #tpu.memory_space<vmem>>, vector<8x12xf32>,
    %195 = vector.extract_strided_slice %72 {offsets = [0, 54], sizes = [1, 16], strides = [1, 1]} : vector<1x72xf32> to vector<1x16xf32>
    %196 = vector.extract_strided_slice %111 {offsets = [0, 42], sizes = [1, 12], strides = [1, 1]} : vector<1x56xf32> to vector<1x12xf32>
    %cst_90 = arith.constant 0.000000e+00 : f32
    %197 = vector.shape_cast %195 : vector<1x16xf32> to vector<1x16xf32>
    %198 = vector.broadcast %197 : vector<1x16xf32> to vector<16x16xf32>
    %199 = vector.broadcast %cst_90 : f32 to vector<16x16xf32>
    %200 = arith.select %122, %198, %199 : vector<16x16xi1>, vector<16x16xf32>
    %cst_91 = arith.constant dense<0.000000e+00> : vector<16xf32>
    %201 = vector.multi_reduction <add>, %200, %cst_91 [1] : vector<16x16xf32> to vector<16xf32>
    %202 = vector.shape_cast %201 : vector<16xf32> to vector<16x1xf32>
    %203 = vector.broadcast %202 : vector<16x1xf32> to vector<16x12xf32>
    %204 = vector.broadcast %196 : vector<1x12xf32> to vector<16x12xf32>
    %205 = arith.mulf %203, %204 : vector<16x12xf32>
    %cst_92 = arith.constant dense<0xFF800000> : vector<12xf32>
    %206 = vector.multi_reduction <maximumf>, %205, %cst_92 [0] : vector<16x12xf32> to vector<12xf32>
    %207 = vector.shape_cast %206 : vector<12xf32> to vector<1x12xf32>
    %208 = vector.broadcast %207 : vector<1x12xf32> to vector<16x12xf32>
    %209 = arith.subf %205, %208 : vector<16x12xf32>
    %210 = math.exp %209 : vector<16x12xf32>
    %cst_93 = arith.constant dense<0.000000e+00> : vector<12xf32>
    %211 = vector.multi_reduction <add>, %210, %cst_93 [0] : vector<16x12xf32> to vector<12xf32>
    %212 = vector.shape_cast %211 : vector<12xf32> to vector<1x12xf32>
    %213 = tpu.reciprocal %212 {approx = true} : vector<1x12xf32> -> vector<1x12xf32>
    %214 = vector.broadcast %213 : vector<1x12xf32> to vector<16x12xf32>
    %215 = arith.mulf %210, %214 : vector<16x12xf32>
    %c0_94 = arith.constant 0 : index
    %c55_95 = arith.constant 55 : index
    %216 = vector.load %arg9[%c0_94, %c55_95] : memref<8x74xf32, #tpu.memory_space<vmem>>, vector<8x16xf32>
    %cst_96 = arith.constant dense<0.000000e+00> : vector<8x12xf32>
    %217 = tpu.matmul %216, %215, %cst_96 {dimension_numbers = #tpu.dot_dimension_numbers<[1], [0], [0], [1], [0, 0, 1, 1], [], []>} : vector<8x16xf32>, vector<16x12xf32>, vector<8x12xf32> -> vector<8x12xf32>
    %c24_97 = arith.constant 24 : index
    %c42 = arith.constant 42 : index
    %218 = vector.load %arg11[%c24_97, %c42] : memref<32x56xf32, #tpu.memory_space<vmem>>, vector<8x12xf32>
    tpu.vector_store %arg11[%c24_97, %c42], %217 {strides = array<i32>} : memref<32x56xf32, #tpu.memory_space<vmem>>, vector<8x12xf32>,
    %c0_98 = arith.constant 0 : index
    %c0_99 = arith.constant 0 : index
    %219 = vector.load %arg6[%c0_98, %c0_99] : memref<4x32xf32, #tpu.memory_space<vmem>>, vector<4x32xf32>
    %c0_100 = arith.constant 0 : index
    %c0_101 = arith.constant 0 : index
    %220 = vector.load %arg11[%c0_100, %c0_101] : memref<32x56xf32, #tpu.memory_space<vmem>>, vector<32x56xf32>
    %cst_102 = arith.constant dense<0.000000e+00> : vector<4x56xf32>
    %221 = tpu.matmul %219, %220, %cst_102 {dimension_numbers = #tpu.dot_dimension_numbers<[1], [0], [0], [1], [0, 0, 1, 1], [], []>} : vector<4x32xf32>, vector<32x56xf32>, vector<4x56xf32> -> vector<4x56xf32>
    %c0_103 = arith.constant 0 : index
    %c0_104 = arith.constant 0 : index
    %222 = vector.load %arg7[%c0_103, %c0_104] : memref<4x1xf32, #tpu.memory_space<vmem>>, vector<4x1xf32>
    %223 = vector.broadcast %222 : vector<4x1xf32> to vector<4x56xf32>
    %224 = arith.addf %221, %223 : vector<4x56xf32>
    %225 = math.tanh %224 : vector<4x56xf32>
    %c0_105 = arith.constant 0 : index
    %c0_106 = arith.constant 0 : index
    %c0_107 = arith.constant 0 : index
    %226 = vector.load %arg8[%c0_105, %c0_106, %c0_107] : memref<1x4x56xf32, #tpu.memory_space<vmem>>, vector<1x4x56xf32>
    %227 = vector.shape_cast %226 : vector<1x4x56xf32> to vector<4x56xf32>
    %228 = vector.shape_cast %225 : vector<4x56xf32> to vector<1x4x56xf32>
    tpu.vector_store %arg8[%c0_105, %c0_106, %c0_107], %228 {strides = array<i32>} : memref<1x4x56xf32, #tpu.memory_space<vmem>>, vector<1x4x56xf32>,
    return
  }
  func.func @transform_0(%arg0: i32) -> (i32, i32, i32) {
    %c0_i32 = arith.constant 0 : i32
    %c0_i32_0 = arith.constant 0 : i32
    %c0_i32_1 = arith.constant 0 : i32
    return %arg0, %c0_i32, %c0_i32_0 : i32, i32, i32
  }
  func.func @transform_1(%arg0: i32) -> (i32, i32, i32) {
    %c0_i32 = arith.constant 0 : i32
    %c0_i32_0 = arith.constant 0 : i32
    %c0_i32_1 = arith.constant 0 : i32
    return %arg0, %c0_i32, %c0_i32_0 : i32, i32, i32
  }
  func.func @transform_2(%arg0: i32) -> (i32, i32) {
    %c0_i32 = arith.constant 0 : i32
    %c0_i32_0 = arith.constant 0 : i32
    %c0_i32_1 = arith.constant 0 : i32
    return %c0_i32, %c0_i32_0 : i32, i32
  }
  func.func @transform_3(%arg0: i32) -> (i32, i32) {
    %c0_i32 = arith.constant 0 : i32
    %c0_i32_0 = arith.constant 0 : i32
    %c0_i32_1 = arith.constant 0 : i32
    return %c0_i32, %c0_i32_0 : i32, i32
  }
  func.func @transform_4(%arg0: i32) -> i32 {
    %c0_i32 = arith.constant 0 : i32
    %c0_i32_0 = arith.constant 0 : i32
    return %c0_i32 : i32
  }
  func.func @transform_5(%arg0: i32) -> (i32, i32) {
    %c0_i32 = arith.constant 0 : i32
    %c0_i32_0 = arith.constant 0 : i32
    %c0_i32_1 = arith.constant 0 : i32
    return %c0_i32, %c0_i32_0 : i32, i32
  }
  func.func @transform_6(%arg0: i32) -> (i32, i32) {
    %c0_i32 = arith.constant 0 : i32
    %c0_i32_0 = arith.constant 0 : i32
    %c0_i32_1 = arith.constant 0 : i32
    return %c0_i32, %c0_i32_0 : i32, i32
  }
  func.func @transform_7(%arg0: i32) -> (i32, i32, i32) {
    %c0_i32 = arith.constant 0 : i32
    %c0_i32_0 = arith.constant 0 : i32
    %c0_i32_1 = arith.constant 0 : i32
    return %arg0, %c0_i32, %c0_i32_0 : i32, i32, i32
  }
}

</mosaic_0001>

<bundles_post_ra>
// kernel: tpu_custom_call.1
= control target key start
LH: loop header
LB: loop body
LE: loop exit
PB: predicated region body
PF: predicated region fallthrough
CT: control target
= control target key end

     0   :  { %12 = vsyncpa [#allocation6], 0  ;;  %s1576_s0 = inlined_call_operand.hbm [shape: f32[4,8,16], index: 0, kind: input, shape index: {}]   ;;  %s1577_s1 = inlined_call_operand.hbm [shape: f32[4,8,12], index: 1, kind: input, shape index: {}]   ;;  %s1578_s2 = inlined_call_operand.vmem [shape: f32[8,8], index: 2, kind: input, shape index: {}]   ;;  %s1579_s3 = inlined_call_operand.vmem [shape: f32[8,8], index: 3, kind: input, shape index: {}]   ;;  %s1580_s4 = inlined_call_operand.hbm [shape: f32[8], index: 4, kind: input, shape index: {}]   ;;  %s1581_s5 = inlined_call_operand.vmem [shape: f32[4,32], index: 5, kind: input, shape index: {}]   ;;  %s1582_s6 = inlined_call_operand.vmem [shape: f32[4,1], index: 6, kind: input, shape index: {}]   ;;  %s1583_s7 = inlined_call_operand.hbm [shape: f32[1,4,56], index: 7, kind: output, shape index: {}]  }
   0x1   :  { %13 = vsyncpa [#allocation10], 0 }
   0x2   :  { %14 = vsyncpa [#allocation8], 0 }
   0x3   :  { %15 = vsyncpa [#allocation7], 0  ;;  %s1315_s24 = smov [#allocation5]   ;;  %s1231_s28 = scalar_lea.hbm %s1576_s0, 512 }
   0x4   :  { %s21_s25 = sshll.u32 %s1315_s24, 4  ;;  %p1232_p0 = scmp.ne.s32.totalorder %s1576_s0, %s1231_s28  ;;  %s22_s25 = int_to_ptr.vmem [resolvable:$true] %s21_s25 }
   0x5   :  { %p1235_p1 = scmp.lt.u32.totalorder %s1231_s28, %s1576_s0 }
   0x7   :  { %p1237_p2 = pnand %p1235_p1, %p1232_p0 }
   0x9   :  { %1240 = shalt.err (!%p1237_p2)
}
   0xa   :  { %s1241_s10 = scalar_lea.vmem %s22_s25, 512  ;;  %p1246_p4 = scmp.lt.s32.totalorder %s22_s25, %s22_s25 }
   0xb   :  { %p1242_p3 = scmp.ne.s32.totalorder %s22_s25, %s1241_s10  ;;  %p1247_p5 = scmp.lt.s32.totalorder %s1241_s10, %s1241_s10 }
   0xd   :  { %p1248_p6 = por %p1247_p5, %p1246_p4 }
   0xf   :  { %p1249_p7 = pnand %p1248_p6, %p1242_p3 }
  0x11   :  { %1252 = shalt.err (!%p1249_p7)
}
  0x12   :  { %s1316_s11 = smov 128   ;;  %s1317_s12 = smov 8  }
  0x13   :  { %27 = dma.hbm_to_vmem [thread:$0]  %s1576_s0, 512, %s22_s25, [#allocation6], %s1316_s11, %s1316_s11, %s1317_s12  }
  0x14   :  { %s1318_s15 = smov [#allocation9]   ;;  %s1253_s19 = scalar_lea.hbm %s1577_s1, 512 }
  0x15   :  { %s33_s16 = sshll.u32 %s1318_s15, 4  ;;  %p1254_p8 = scmp.ne.s32.totalorder %s1577_s1, %s1253_s19  ;;  %s34_s16 = int_to_ptr.vmem [resolvable:$true] %s33_s16 }
  0x16   :  { %p1257_p9 = scmp.lt.u32.totalorder %s1253_s19, %s1577_s1 }
  0x18   :  { %p1259_p10 = pnand %p1257_p9, %p1254_p8 }
  0x1a   :  { %1262 = shalt.err (!%p1259_p10)
}
  0x1b   :  { %s1263_s24 = scalar_lea.vmem %s34_s16, 512  ;;  %p1268_p12 = scmp.lt.s32.totalorder %s34_s16, %s34_s16 }
  0x1c   :  { %p1264_p11 = scmp.ne.s32.totalorder %s34_s16, %s1263_s24  ;;  %p1269_p13 = scmp.lt.s32.totalorder %s1263_s24, %s1263_s24 }
  0x1e   :  { %p1270_p0 = por %p1269_p13, %p1268_p12 }
  0x20   :  { %p1271_p1 = pnand %p1270_p0, %p1264_p11 }
  0x22   :  { %1274 = shalt.err (!%p1271_p1)
}
  0x23   :  { %39 = dma.hbm_to_vmem [thread:$0]  %s1577_s1, 512, %s34_s16, [#allocation10], %s1316_s11, %s1316_s11, %s1317_s12  }
  0x24   :  { %s1275_s28 = scalar_lea.hbm %s1580_s4, 16 }
  0x25   :  { %p1276_p2 = scmp.ne.s32.totalorder %s1580_s4, %s1275_s28  ;;  %p1279_p3 = scmp.lt.u32.totalorder %s1275_s28, %s1580_s4 }
  0x27   :  { %p1281_p4 = pnand %p1279_p3, %p1276_p2 }
  0x29   :  { %1284 = shalt.err (!%p1281_p4)
}
  0x2a   :  { %s1319_s10 = smov [#allocation11]  }
  0x2b   :  { %51 = dma.hbm_to_smem %s1580_s4, 16, %s1319_s10, [#allocation8]  }
  0x2c   :  { %1307 = dma.done.wait [#allocation6], 512  }
  0x2d   :  { %1308 = vsyncadd [#allocation6], 4294966784 }
  0x2e   :  { %1309 = dma.done.wait [#allocation10], 512  }
  0x2f   :  { %1310 = vsyncadd [#allocation10], 4294966784 }
  0x30   :  { %1311 = dma.done.wait [#allocation8], 16  }
  0x31   :  { %1312 = vsyncadd [#allocation8], 4294967280 }
  0x32   :  { %65 = sfence }
  0x33   :  { %v70_v0 = vld [vmem:[#allocation5] sm:$0xff]  ;;  %v101_v1 = vld [vmem:[#allocation5 + $0x10] sm:$0xff]  ;;  %s1320_s1 = smov 1   ;;  %s1321_s11 = smov 37   ;;  %vm66_vm0 = vcmask 605184   ;;  %v85_v2 = vld [vmem:[#allocation5 + $0x8] sm:$0xff]  ;;  %v400_v32 = vlaneseq }
  0x34   :  { %72 = vrot.lane.b32.xlu0 %v70_v0, %s1320_s1  ;;  %103 = vrot.lane.b32.xlu1 %v101_v1, %s1321_s11  ;;  %v117_v3 = vld [vmem:[#allocation5 + $0x18] sm:$0xff]  ;;  %v1322_v4 = vmov 0.0   ;;  %vm1323_vm1 = vmmov 0   ;;  %vm68_vm2 = vcmask 474112   ;;  %s1324_s4 = smov 19   ;;  %s1325_s12 = smov 55  }
  0x35   :  { %67 = vst.msk [vmem:[#allocation2] sm:$0xff] %vm66_vm0, %v1322_v4  ;;  %1066 = vmatprep.subr.mxu0 %v1322_v4  ;;  %1071 = vmatprep.subr.mxu1 %v1322_v4  ;;  %v77_v5 = vld [vmem:[#allocation9] sm:$0xff]  ;;  %v93_v6 = vld [vmem:[#allocation9 + $0x8] sm:$0xff]  ;;  %s1326_s15 = smov 15   ;;  %vm385_vm3 = vcmask 457728   ;;  %v109_v7 = vld [vmem:[#allocation9 + $0x10] sm:$0xff] }
  0x36   :  { %1068 = vmatprep.mubr.msk.f32.mxu0 %vm1323_vm1, %v1322_v4  ;;  %1073 = vmatprep.mubr.msk.f32.mxu1 %vm1323_vm1, %v1322_v4  ;;  %69 = vst.msk [vmem:[#allocation3] sm:$0xff] %vm68_vm2, %v1322_v4  ;;  %v125_v8 = vld [vmem:[#allocation9 + $0x18] sm:$0xff]  ;;  %s1327_s16 = smov 29   ;;  %s1328_s17 = smov 43   ;;  %vm75_vm4 = vcmask 138248   ;;  %vm90_vm5 = vcmask 285848  }
  0x37   :  { %399 = vst.msk [vmem:[#allocation4 + $0x18] sm:$0xff] %vm385_vm3, %v1322_v4  ;;  %vm106_vm6 = vcmask 433448   ;;  %vm122_vm7 = vcmask 581048   ;;  %vm82_vm8 = vcmask 105480   ;;  %vm98_vm9 = vcmask 220280   ;;  %v132_v17 = vld [vmem:[%s1578_s2] sm:$0xff] }
  0x38   :  { %87 = vrot.lane.b32.xlu0 %v85_v2, %s1324_s4  ;;  %119 = vrot.lane.b32.xlu1 %v117_v3, %s1325_s12  ;;  %vm114_vm10 = vcmask 335080   ;;  %vm130_vm11 = vcmask 449880   ;;  %vm134_vm12 = vcmask 64512   ;;  %v208_v19 = vld [vmem:[%s1579_s3] sm:$0xff]  ;;  %s1031_s2 = sld [smem:[#allocation11 + $0x3]]  ;;  %s1329_s3 = smov 126  }
  0x39   :  { %s1330_s22 = smov 127   ;;  %s1030_s23 = sld [smem:[#allocation11 + $0x2]]  ;;  %v1452_v33 = vshrl.u32 %v400_v32, 7  ;;  %v1457_v35 = vand.u32 127, %v400_v32  ;;  %vm413_vm15 = vcmask 130048   ;;  %vm805_vm0 = vcmask 441680  }
  0x3a   :  { %s1029_s24 = sld [smem:[#allocation11 + $0x1]]  ;;  %s294_s0 = sld [smem:[#allocation11]]  ;;  %vm675_vm2 = vcmask 326880  }
  0x3b   :  { %v1455_v34 = vadd.s32 8, %v1452_v33  ;;  %vm405_vm14 = vcmp.eq.s32.totalorder %v1452_v33, %v1457_v35  ;;  %v409_v58 = vsub.s32 0, %v1452_v33  ;;  %s1331_s25 = smov 92   ;;  %s1332_s26 = smov 110  }
  0x3c   :  { %79 = vrot.lane.b32.xlu0 %v77_v5, %s1320_s1  ;;  %95 = vrot.lane.b32.xlu1 %v93_v6, %s1326_s15  ;;  %s1333_s27 = smov 74   ;;  %s1037_s28 = sld [smem:[#allocation11 + $0x7]] }
  0x3d   :  { %vm406_vm13 = vcmp.eq.s32.totalorder %v1455_v34, %v1457_v35  ;;  %s1036_s29 = sld [smem:[#allocation11 + $0x6]]  ;;  %s1035_s30 = sld [smem:[#allocation11 + $0x5]]  ;;  %v1334_v35 = vmov 0.0|0.0  }
  0x3e   :  { %v304_v21 = vstv %s1031_s2  ;;  %s1034_s8 = sld [smem:[#allocation11 + $0x4]]  ;;  %s1335_s9 = smov 100  }
  0x3f   :  { %v301_v28 = vstv %s1030_s23  ;;  %s1336_s10 = smov 114   ;;  %s1337_s13 = smov 86  }
  0x40   :  { %111 = vrot.lane.b32.xlu0 %v109_v7, %s1327_s16  ;;  %127 = vrot.lane.b32.xlu1 %v125_v8, %s1328_s17  ;;  %v298_v46 = vstv %s1029_s24  ;;  %v295_v50 = vstv %s294_s0  ;;  %s1338_s14 = smov 91   ;;  %s1339_s1 = smov 109  }
  0x41   :  { %s1340_s11 = smov 73   ;;  %s1341_s4 = smov 28  }
  0x42   :  { %v355_v2 = vstv %s1037_s28  ;;  %s1342_s12 = smov 14   ;;  %s1343_s15 = smov 42  }
  0x43   :  { %v352_v8 = vstv %s1036_s29  ;;  %s1345_s19 = smov [#allocation12]  }
  0x44   :  { %s1016_s20 = sshll.u32 %s1345_s19, 4  ;;  %s1017_s20 = int_to_ptr.vmem [resolvable:$true] %s1016_s20 }
  0x45   :  { %s1285_s21 = scalar_lea.vmem %s1017_s20, 64  ;;  %p1290_p6 = scmp.lt.s32.totalorder %s1017_s20, %s1017_s20 }
  0x46   :  { %p1286_p5 = scmp.ne.s32.totalorder %s1017_s20, %s1285_s21  ;;  %p1291_p7 = scmp.lt.s32.totalorder %s1285_s21, %s1285_s21 }
  0x48   :  { %p1292_p8 = por %p1291_p7, %p1290_p6 }
  0x4a   :  { %p1293_p9 = pnand %p1292_p8, %p1286_p5 }
  0xa6   :  { %v73_v9 = vpop.permute.xlu0 %72  ;;  %v104_v10 = vpop.permute.xlu1 %103 }
  0xa7   :  { %76 = vst.msk [vmem:[#allocation2] sm:$0xff] %vm75_vm4, %v73_v9  ;;  %vm545_vm4 = vcmask 212080  }
  0xaa   :  { %v88_v11 = vpop.permute.xlu0 %87  ;;  %v120_v12 = vpop.permute.xlu1 %119 }
  0xab   :  { %91 = vst.msk [vmem:[#allocation2] sm:$0xff] %vm90_vm5, %v88_v11  ;;  %vm426_vm5 = vcmask 97280  }
  0xac   :  { %107 = vst.msk [vmem:[#allocation2] sm:$0xff] %vm106_vm6, %v104_v10 }
  0xad   :  { %123 = vst.msk [vmem:[#allocation2] sm:$0xff] %vm122_vm7, %v120_v12 }
  0xae   :  { %v80_v13 = vpop.permute.xlu0 %79  ;;  %v96_v14 = vpop.permute.xlu1 %95 }
  0xaf   :  { %83 = vst.msk [vmem:[#allocation3] sm:$0xff] %vm82_vm8, %v80_v13 }
  0xb0   :  { %99 = vst.msk [vmem:[#allocation3] sm:$0xff] %vm98_vm9, %v96_v14 }
  0xb2   :  { %v112_v15 = vpop.permute.xlu0 %111  ;;  %v128_v16 = vpop.permute.xlu1 %127 }
  0xb3   :  { %115 = vst.msk [vmem:[#allocation3] sm:$0xff] %vm114_vm10, %v112_v15 }
  0xb4   :  { %v1435_v18 = vld [vmem:[#allocation2] sm:$0xff]  ;;  %131 = vst.msk [vmem:[#allocation3] sm:$0xff] %vm130_vm11, %v128_v16 }
  0xb5   :  { %1067 = vmatpush3.msra.mxu0 %v1435_v18 }
  0xb6   :  { %1069 = vmatmul.mubr.msk.f32.vlgmr.msra.gmra.mrb[0].mxu0 %vm134_vm12, %v132_v17  ;;  %1121 = vmatprep.subr.bf16.mxu0 %v1334_v35 }
  0xb7   :  { %1094 = vmatprep.mubr.msk.f32.mxu0 %vm1323_vm1, %v1322_v4 }
  0xbb   :  { %v1443_v20 = vld [vmem:[#allocation3] sm:$0xff] }
  0xbc   :  { %1072 = vmatpush3.msra.mxu1 %v1443_v20  ;;  %386 = vst.msk [vmem:[#allocation4] sm:$0xff] %vm385_vm3, %v1443_v20 }
  0xbd   :  { %1074 = vmatmul.mubr.msk.f32.vlgmr.msra.gmra.mrb[0].mxu1 %vm134_vm12, %v208_v19  ;;  %1115 = vmatprep.subr.bf16.mxu1 %v1334_v35 }
  0xbe   :  { %1080 = vmatprep.mubr.msk.f32.mxu1 %vm1323_vm1, %v1322_v4 }
 0x189   :  { %v204_v22 = vpop.f32.mrb[0].mxu0 }
 0x18a   :  { %v305_v23 = vadd.f32 %v304_v21, %v204_v22  ;;  %v1070_v24 = vpop.f32.mrb[1].mxu0  ;;  %v289_v25 = vrot.slane %v204_v22, 2  ;;  %v284_v26 = vrot.slane %v204_v22, 1  ;;  %v302_v30 = vadd.f32 %v301_v28, %v204_v22 }
 0x18c   :  { %v1033_v27 = vmul.f32 -1.442695, %v305_v23  ;;  %290 = vrot.lane.b32.xlu1 %v289_v25, %s1329_s3  ;;  %285 = vrot.lane.b32.xlu0 %v284_v26, %s1330_s22 }
 0x18e   :  { %1181 = vpow2.f32 %v1033_v27 }
 0x190   :  { %v1463_v39 = vpop.f32.mrb[0].mxu1 }
 0x191   :  { %v1075_v41 = vpop.f32.mrb[1].mxu1  ;;  %v335_v62 = vrot.slane %v1463_v39, 1  ;;  %v340_v1 = vrot.slane %v1463_v39, 2  ;;  %v356_v3 = vadd.f32 %v355_v2, %v1463_v39  ;;  %v353_v11 = vadd.f32 %v352_v8, %v1463_v39 }
 0x192   :  { %v349_v41 = vstv %s1035_s30 }
 0x193   :  { %v1039_v5 = vmul.f32 -1.442695, %v356_v3 }
 0x198   :  { %v1182_v29 = vpop.eup %1181 }
 0x199   :  { %v321_v31 = vadd.f32 1.0, %v1182_v29 }
 0x19b   :  { %1183 = vrcp.f32 %v321_v31 }
 0x19c   :  { %1185 = vtanh.f32 %v302_v30 }
 0x1a5   :  { %v1184_v36 = vpop.eup %1183 }
 0x1a6   :  { %v325_v37 = vrot.slane %v1184_v36, 1  ;;  %v1186_v38 = vpop.eup %1185 }
 0x1a8   :  { %v327_v40 = vmul.f32 %v1186_v38, %v325_v37 }
 0x1aa   :  { %v329_v42 = vrot.slane %v327_v40, 6 }
 0x1ac   :  { %330 = vrot.lane.b32.xlu0 %v329_v42, %s1330_s22 }
 0x1fe   :  { %v286_v43 = vpop.permute.xlu0 %285  ;;  %v291_v45 = vpop.permute.xlu1 %290 }
 0x1ff   :  { %v288_v44 = vadd.f32 %v286_v43, %v204_v22 }
 0x201   :  { %v293_v47 = vadd.f32 %v291_v45, %v288_v44 }
 0x203   :  { %v299_v48 = vadd.f32 %v298_v46, %v293_v47  ;;  %v296_v52 = vadd.f32 %v295_v50, %v293_v47  ;;  %v346_v46 = vstv %s1034_s8 }
 0x205   :  { %v1032_v49 = vmul.f32 -1.442695, %v299_v48 }
 0x207   :  { %1187 = vpow2.f32 %v1032_v49 }
 0x211   :  { %v1188_v51 = vpop.eup %1187 }
 0x212   :  { %v310_v53 = vadd.f32 1.0, %v1188_v51 }
 0x214   :  { %1189 = vrcp.f32 %v310_v53 }
 0x215   :  { %1191 = vtanh.f32 %v296_v52 }
 0x216   :  { %1193 = vpow2.f32 %v1039_v5 }
 0x21e   :  { %v1190_v54 = vpop.eup %1189  ;;  %v331_v59 = vpop.permute.xlu0 %330 }
 0x21f   :  { %v314_v55 = vrot.slane %v1190_v54, 3  ;;  %v1192_v56 = vpop.eup %1191 }
 0x220   :  { %v1194_v6 = vpop.eup %1193 }
 0x221   :  { %v316_v57 = vmul.f32 %v1192_v56, %v314_v55  ;;  %v372_v7 = vadd.f32 1.0, %v1194_v6 }
 0x223   :  { %v333_v60 = vadd.f32 %v331_v59, %v316_v57  ;;  %1195 = vrcp.f32 %v372_v7 }
 0x224   :  { %1197 = vtanh.f32 %v353_v11 }
 0x225   :  { %v410_v61 = vrot.slane %v333_v60, %v409_v58 }
 0x227   :  { %662 = vrot.lane.b32.xlu0 %v410_v61, %s1331_s25  ;;  %532 = vrot.lane.b32.xlu1 %v410_v61, %s1332_s26  ;;  %v411_v63 = vsel %vm405_vm14, %v410_v61, 0.0  ;;  %v412_v0 = vsel %vm406_vm13, %v410_v61, 0.0 }
 0x228   :  { %v414_v30 = vsel %vm413_vm15, %v411_v63, 0.0  ;;  %v417_v32 = vsel %vm413_vm15, %v412_v0, 0.0 }
 0x22b   :  { %336 = vrot.lane.b32.xlu0 %v335_v62, %s1330_s22  ;;  %792 = vrot.lane.b32.xlu1 %v410_v61, %s1333_s27 }
 0x22d   :  { %v1196_v25 = vpop.eup %1195 }
 0x22e   :  { %v376_v28 = vrot.slane %v1196_v25, 1  ;;  %v1198_v29 = vpop.eup %1197 }
 0x22f   :  { %341 = vrot.lane.b32.xlu1 %v340_v1, %s1329_s3 }
 0x230   :  { %v378_v31 = vmul.f32 %v1198_v29, %v376_v28 }
 0x232   :  { %v380_v36 = vrot.slane %v378_v31, 6 }
 0x299   :  { %v663_v9 = vpop.permute.xlu0 %662  ;;  %v533_v10 = vpop.permute.xlu1 %532 }
 0x29a   :  { %v536_v12 = vsel %vm406_vm13, %v533_v10, 0.0  ;;  %v535_v13 = vsel %vm405_vm14, %v533_v10, 0.0  ;;  %v665_v16 = vsel %vm405_vm14, %v663_v9, 0.0  ;;  %v666_v23 = vsel %vm406_vm13, %v663_v9, 0.0 }
 0x29b   :  { %v540_v14 = vsel %vm413_vm15, %v536_v12, 0.0  ;;  %v537_v15 = vsel %vm413_vm15, %v535_v13, 0.0  ;;  %v667_v21 = vsel %vm413_vm15, %v665_v16, 0.0  ;;  %v670_v24 = vsel %vm413_vm15, %v666_v23, 0.0 }
 0x29c   :  { %541 = vadd.xlane.f32.xlu1 %v540_v14  ;;  %538 = vadd.xlane.f32.xlu0 %v537_v15 }
 0x29d   :  { %v793_v17 = vpop.permute.xlu1 %792  ;;  %v337_v34 = vpop.permute.xlu0 %336 }
 0x29e   :  { %v795_v19 = vsel %vm405_vm14, %v793_v17, 0.0  ;;  %v796_v26 = vsel %vm406_vm13, %v793_v17, 0.0  ;;  %v339_v38 = vadd.f32 %v337_v34, %v1463_v39 }
 0x29f   :  { %v797_v22 = vsel %vm413_vm15, %v795_v19, 0.0  ;;  %v800_v27 = vsel %vm413_vm15, %v796_v26, 0.0 }
 0x2a0   :  { %668 = vadd.xlane.f32.xlu0 %v667_v21  ;;  %798 = vadd.xlane.f32.xlu1 %v797_v22 }
 0x2a1   :  { %v342_v37 = vpop.permute.xlu1 %341 }
 0x2a2   :  { %v344_v40 = vadd.f32 %v342_v37, %v339_v38 }
 0x2a4   :  { %671 = vadd.xlane.f32.xlu0 %v670_v24  ;;  %v350_v42 = vadd.f32 %v349_v41, %v344_v40  ;;  %v347_v47 = vadd.f32 %v346_v46, %v344_v40 }
 0x2a6   :  { %v1038_v43 = vmul.f32 -1.442695, %v350_v42 }
 0x2a8   :  { %801 = vadd.xlane.f32.xlu0 %v800_v27  ;;  %1199 = vpow2.f32 %v1038_v43 }
 0x2ac   :  { %415 = vadd.xlane.f32.xlu0 %v414_v30 }
 0x2b0   :  { %418 = vadd.xlane.f32.xlu0 %v417_v32 }
 0x2b1   :  { %381 = vrot.lane.b32.xlu1 %v380_v36, %s1330_s22 }
 0x2b2   :  { %v1200_v44 = vpop.eup %1199 }
 0x2b3   :  { %v361_v45 = vadd.f32 1.0, %v1200_v44 }
 0x2b5   :  { %456 = vrot.lane.b32.xlu1 %v1435_v18, %s1330_s22  ;;  %1201 = vrcp.f32 %v361_v45 }
 0x2b6   :  { %1203 = vtanh.f32 %v347_v47 }
 0x2bf   :  { %v1202_v48 = vpop.eup %1201 }
 0x2c0   :  { %v365_v51 = vrot.slane %v1202_v48, 3  ;;  %v1204_v54 = vpop.eup %1203 }
 0x2c2   :  { %v367_v39 = vmul.f32 %v1204_v54, %v365_v51 }
 0x329   :  { %v539_v49 = vpop.xlane.xlu0 %538  ;;  %v542_v50 = vpop.xlane.xlu1 %541 }
 0x32d   :  { %v669_v52 = vpop.xlane.xlu0 %668  ;;  %v799_v53 = vpop.xlane.xlu1 %798 }
 0x331   :  { %v672_v55 = vpop.xlane.xlu0 %671  ;;  %v382_v56 = vpop.permute.xlu1 %381 }
 0x332   :  { %v384_v57 = vadd.f32 %v382_v56, %v367_v39 }
 0x334   :  { %v423_v59 = vrot.slane %v384_v57, %v409_v58 }
 0x335   :  { %v802_v60 = vpop.xlane.xlu0 %801 }
 0x336   :  { %v803_v61 = vmul.f32 %v799_v53, %v423_v59  ;;  %v804_v62 = vmul.f32 %v802_v60, %v423_v59  ;;  %v673_v63 = vmul.f32 %v669_v52, %v423_v59  ;;  %v674_v0 = vmul.f32 %v672_v55, %v423_v59 }
 0x337   :  { %v543_v1 = vmul.f32 %v539_v49, %v423_v59  ;;  %v544_v2 = vmul.f32 %v542_v50, %v423_v59 }
 0x338   :  { %v806_v3 = vsel %vm805_vm0, %v803_v61, -inf  ;;  %v807_v5 = vsel %vm805_vm0, %v804_v62, -inf  ;;  %v676_v6 = vsel %vm675_vm2, %v673_v63, -inf  ;;  %v677_v7 = vsel %vm675_vm2, %v674_v0, -inf }
 0x339   :  { %v808_v33 = vmax.f32 %v806_v3, %v807_v5  ;;  %v416_v58 = vpop.xlane.xlu0 %415  ;;  %v678_v8 = vmax.f32 %v676_v6, %v677_v7  ;;  %v546_v9 = vsel %vm545_vm4, %v543_v1, -inf  ;;  %v547_v10 = vsel %vm545_vm4, %v544_v2, -inf }
 0x33a   :  { %v548_v11 = vmax.f32 %v546_v9, %v547_v10  ;;  %v424_v14 = vmul.f32 %v423_v59, %v416_v58 }
 0x33b   :  { %v809_v12 = vrot.slane %v808_v33, 4  ;;  %v679_v13 = vrot.slane %v678_v8, 4 }
 0x33c   :  { %v549_v15 = vrot.slane %v548_v11, 4  ;;  %v427_v25 = vsel %vm426_vm5, %v424_v14, -inf }
 0x33d   :  { %v810_v16 = vmax.f32 %v808_v33, %v809_v12  ;;  %v419_v17 = vpop.xlane.xlu0 %418  ;;  %v680_v19 = vmax.f32 %v678_v8, %v679_v13 }
 0x33e   :  { %v425_v21 = vmul.f32 %v423_v59, %v419_v17  ;;  %v550_v22 = vmax.f32 %v548_v11, %v549_v15 }
 0x33f   :  { %v811_v23 = vrot.slane %v810_v16, 2  ;;  %v681_v24 = vrot.slane %v680_v19, 2 }
 0x340   :  { %v428_v26 = vsel %vm426_vm5, %v425_v21, -inf  ;;  %v551_v27 = vrot.slane %v550_v22, 2 }
 0x341   :  { %v812_v28 = vmax.f32 %v810_v16, %v811_v23  ;;  %v429_v29 = vmax.f32 %v427_v25, %v428_v26  ;;  %v682_v30 = vmax.f32 %v680_v19, %v681_v24 }
 0x342   :  { %v552_v31 = vmax.f32 %v550_v22, %v551_v27 }
 0x343   :  { %v813_v32 = vrot.slane %v812_v28, 1  ;;  %v430_v36 = vrot.slane %v429_v29, 4  ;;  %v683_v34 = vrot.slane %v682_v30, 1 }
 0x344   :  { %v553_v37 = vrot.slane %v552_v31, 1 }
 0x345   :  { %v814_v38 = vmax.f32 %v812_v28, %v813_v32  ;;  %v431_v40 = vmax.f32 %v429_v29, %v430_v36  ;;  %v684_v41 = vmax.f32 %v682_v30, %v683_v34 }
 0x346   :  { %v554_v42 = vmax.f32 %v552_v31, %v553_v37 }
 0x347   :  { %v815_v43 = vsub.f32 %v803_v61, %v814_v38  ;;  %v816_v44 = vsub.f32 %v804_v62, %v814_v38  ;;  %v432_v45 = vrot.slane %v431_v40, 2  ;;  %v685_v46 = vsub.f32 %v673_v63, %v684_v41 }
 0x348   :  { %v686_v47 = vsub.f32 %v674_v0, %v684_v41  ;;  %v555_v48 = vsub.f32 %v543_v1, %v554_v42  ;;  %v556_v49 = vsub.f32 %v544_v2, %v554_v42 }
 0x349   :  { %v817_v50 = vmul.f32 1.442695, %v815_v43  ;;  %v819_v51 = vmul.f32 1.442695, %v816_v44  ;;  %v433_v52 = vmax.f32 %v431_v40, %v432_v45  ;;  %v687_v53 = vmul.f32 1.442695, %v685_v46 }
 0x34a   :  { %v689_v54 = vmul.f32 1.442695, %v686_v47  ;;  %v557_v55 = vmul.f32 1.442695, %v555_v48  ;;  %v559_v56 = vmul.f32 1.442695, %v556_v49 }
 0x34b   :  { %1205 = vpow2.f32 %v817_v50  ;;  %v434_v39 = vrot.slane %v433_v52, 1 }
 0x34c   :  { %1207 = vpow2.f32 %v819_v51 }
 0x34d   :  { %v435_v57 = vmax.f32 %v433_v52, %v434_v39  ;;  %1209 = vpow2.f32 %v687_v53 }
 0x34e   :  { %1211 = vpow2.f32 %v689_v54 }
 0x34f   :  { %v436_v59 = vsub.f32 %v424_v14, %v435_v57  ;;  %v437_v60 = vsub.f32 %v425_v21, %v435_v57  ;;  %1213 = vpow2.f32 %v557_v55 }
 0x350   :  { %1215 = vpow2.f32 %v559_v56 }
 0x351   :  { %v438_v61 = vmul.f32 1.442695, %v436_v59  ;;  %v440_v62 = vmul.f32 1.442695, %v437_v60 }
 0x353   :  { %1217 = vpow2.f32 %v438_v61 }
 0x354   :  { %1219 = vpow2.f32 %v440_v62 }
 0x355   :  { %v1206_v63 = vpop.eup %1205 }
 0x356   :  { %v1208_v0 = vpop.eup %1207  ;;  %v821_v1 = vsel %vm805_vm0, %v1206_v63, 0.0 }
 0x357   :  { %v1210_v2 = vpop.eup %1209  ;;  %v822_v3 = vsel %vm805_vm0, %v1208_v0, 0.0 }
 0x358   :  { %v1212_v5 = vpop.eup %1211  ;;  %v823_v6 = vadd.f32 %v822_v3, %v821_v1  ;;  %v691_v7 = vsel %vm675_vm2, %v1210_v2, 0.0 }
 0x359   :  { %v1214_v33 = vpop.eup %1213  ;;  %v692_v58 = vsel %vm675_vm2, %v1212_v5, 0.0 }
 0x35a   :  { %v1216_v8 = vpop.eup %1215  ;;  %v824_v9 = vrot.slane %v823_v6, 4  ;;  %v693_v10 = vadd.f32 %v692_v58, %v691_v7  ;;  %v561_v11 = vsel %vm545_vm4, %v1214_v33, 0.0 }
 0x35b   :  { %v562_v12 = vsel %vm545_vm4, %v1216_v8, 0.0 }
 0x35c   :  { %v825_v13 = vadd.f32 %v824_v9, %v823_v6  ;;  %v694_v14 = vrot.slane %v693_v10, 4  ;;  %v563_v15 = vadd.f32 %v562_v12, %v561_v11 }
 0x35d   :  { %v1218_v16 = vpop.eup %1217 }
 0x35e   :  { %v1220_v17 = vpop.eup %1219  ;;  %v826_v19 = vrot.slane %v825_v13, 2  ;;  %v442_v21 = vsel %vm426_vm5, %v1218_v16, 0.0  ;;  %v695_v22 = vadd.f32 %v694_v14, %v693_v10  ;;  %v564_v23 = vrot.slane %v563_v15, 4  ;;  %v923_v14 = vld [vmem:[#allocation4] sm:$0xff] }
 0x35f   :  { %v443_v24 = vsel %vm426_vm5, %v1220_v17, 0.0 }
 0x360   :  { %v444_v25 = vadd.f32 %v443_v24, %v442_v21  ;;  %v696_v26 = vrot.slane %v695_v22, 2  ;;  %v565_v27 = vadd.f32 %v564_v23, %v563_v15  ;;  %v827_v28 = vadd.f32 %v826_v19, %v825_v13 }
 0x362   :  { %v445_v29 = vrot.slane %v444_v25, 4  ;;  %v697_v30 = vadd.f32 %v696_v26, %v695_v22  ;;  %v566_v31 = vrot.slane %v565_v27, 2  ;;  %v828_v32 = vrot.slane %v827_v28, 1  ;;  %v927_v26 = vld [vmem:[%s1582_s6] sm:$0xf] }
 0x364   :  { %v446_v36 = vadd.f32 %v445_v29, %v444_v25  ;;  %v698_v34 = vrot.slane %v697_v30, 1  ;;  %v567_v37 = vadd.f32 %v566_v31, %v565_v27  ;;  %v829_v38 = vadd.f32 %v828_v32, %v827_v28 }
 0x366   :  { %v447_v40 = vrot.slane %v446_v36, 2  ;;  %v699_v41 = vadd.f32 %v698_v34, %v697_v30  ;;  %v568_v42 = vrot.slane %v567_v37, 1  ;;  %1221 = vrcp.f32 %v829_v38 }
 0x368   :  { %v448_v43 = vadd.f32 %v447_v40, %v446_v36  ;;  %1223 = vrcp.f32 %v699_v41  ;;  %v569_v44 = vadd.f32 %v568_v42, %v567_v37  ;;  %v922_v36 = vld [vmem:[%s1581_s5] sm:$0xf] }
 0x36a   :  { %v449_v45 = vrot.slane %v448_v43, 1  ;;  %1225 = vrcp.f32 %v569_v44 }
 0x36c   :  { %v450_v46 = vadd.f32 %v449_v45, %v448_v43 }
 0x36e   :  { %1227 = vrcp.f32 %v450_v46 }
 0x370   :  { %v1222_v47 = vpop.eup %1221 }
 0x371   :  { %v831_v52 = vmul.f32 %v1222_v47, %v1206_v63  ;;  %v832_v55 = vmul.f32 %v1222_v47, %v1208_v0  ;;  %v457_v63 = vpop.permute.xlu1 %456 }
 0x372   :  { %v1224_v48 = vpop.eup %1223 }
 0x373   :  { %v701_v49 = vmul.f32 %v1224_v48, %v1210_v2  ;;  %v702_v50 = vmul.f32 %v1224_v48, %v1212_v5  ;;  %v1174_v59 = vpack.i.bf16 %v832_v55, %v831_v52 }
 0x374   :  { %v1226_v51 = vpop.eup %1225 }
 0x375   :  { %v1169_v53 = vpack.i.bf16 %v702_v50, %v701_v49  ;;  %v571_v54 = vmul.f32 %v1226_v51, %v1214_v33  ;;  %v572_v39 = vmul.f32 %v1226_v51, %v1216_v8 }
 0x377   :  { %1170 = vrot.lane.b32.xlu1 %v1169_v53, %s1335_s9  ;;  %v1164_v56 = vpack.i.bf16 %v572_v39, %v571_v54 }
 0x378   :  { %v1228_v57 = vpop.eup %1227 }
 0x379   :  { %1165 = vrot.lane.b32.xlu0 %v1164_v56, %s1336_s10  ;;  %v452_v60 = vmul.f32 %v1228_v57, %v1218_v16  ;;  %v453_v61 = vmul.f32 %v1228_v57, %v1220_v17 }
 0x37b   :  { %1175 = vrot.lane.b32.xlu1 %v1174_v59, %s1337_s13  ;;  %v1116_v62 = vpack.c.bf16 %v453_v61, %v452_v60 }
 0x37d   :  { %705 = vrot.lane.b32.xlu0 %v1435_v18, %s1338_s14  ;;  %1117 = vmatpush3.bf16.msra.mxu1 %v1116_v62 }
 0x37e   :  { %1118 = vmatprep.subr.bf16.mxu1 %v1334_v35 }
 0x37f   :  { %575 = vrot.lane.b32.xlu1 %v1435_v18, %s1339_s1 }
 0x380   :  { %1081 = vmatmul.mubr.msk.f32.vlgmr.msra.gmra.mrb[2].mxu1 %vm413_vm15, %v457_v63 }
 0x381   :  { %389 = vrot.lane.b32.xlu0 %v1443_v20, %s1330_s22  ;;  %1087 = vmatprep.mubr.msk.f32.mxu1 %vm1323_vm1, %v1322_v4 }
 0x383   :  { %835 = vrot.lane.b32.xlu1 %v1435_v18, %s1340_s11 }
 0x3e9   :  { %v1171_v0 = vpop.permute.xlu1 %1170 }
 0x3ea   :  { %v1173_v1 = vunpack.i.h.bf16 %v1171_v0  ;;  %v1172_v2 = vunpack.i.l.bf16 %v1171_v0 }
 0x3eb   :  { %v1166_v3 = vpop.permute.xlu0 %1165 }
 0x3ec   :  { %v1122_v5 = vpack.c.bf16 %v1173_v1, %v1172_v2  ;;  %v1168_v6 = vunpack.i.h.bf16 %v1166_v3  ;;  %v1167_v7 = vunpack.i.l.bf16 %v1166_v3 }
 0x3ed   :  { %v1176_v33 = vpop.permute.xlu1 %1175 }
 0x3ee   :  { %v1119_v58 = vpack.c.bf16 %v1168_v6, %v1167_v7  ;;  %v1178_v8 = vunpack.i.h.bf16 %v1176_v33  ;;  %v1177_v9 = vunpack.i.l.bf16 %v1176_v33  ;;  %1123 = vmatpush3.bf16.msra.mxu0 %v1122_v5 }
 0x3ef   :  { %v706_v10 = vpop.permute.xlu0 %705  ;;  %1127 = vmatprep.subr.bf16.mxu0 %v1334_v35 }
 0x3f0   :  { %v1125_v11 = vpack.c.bf16 %v1178_v8, %v1177_v9  ;;  %1120 = vmatpush3.bf16.msra.mxu1 %v1119_v58 }
 0x3f1   :  { %v576_v12 = vpop.permute.xlu1 %575  ;;  %1095 = vmatmul.mubr.msk.f32.vlgmr.msra.gmra.mrb[2].mxu0 %vm413_vm15, %v706_v10  ;;  %1124 = vmatprep.subr.bf16.mxu1 %v1334_v35 }
 0x3f2   :  { %1112 = vmatprep.mubr.msk.f32.mxu0 %vm1323_vm1, %v1322_v4 }
 0x3f3   :  { %v390_v18 = vpop.permute.xlu0 %389  ;;  %1088 = vmatmul.mubr.msk.f32.vlgmr.msra.gmra.mrb[4].mxu1 %vm413_vm15, %v576_v12 }
 0x3f4   :  { %392 = vst.msk [vmem:[#allocation4 + $0x8] sm:$0xff] %vm385_vm3, %v390_v18  ;;  %1126 = vmatpush3.bf16.msra.mxu1 %v1125_v11  ;;  %1101 = vmatprep.mubr.msk.f32.mxu1 %vm1323_vm1, %v1322_v4  ;;  %vm933_vm1 = vcmask 261120  }
 0x3f5   :  { %v836_v13 = vpop.permute.xlu1 %835 }
 0x3f7   :  { %1102 = vmatmul.mubr.msk.f32.vlgmr.msra.gmra.mrb[6].mxu1 %vm413_vm15, %v836_v13 }
 0x3fb   :  { %v924_v15 = vld [vmem:[#allocation4 + $0x8] sm:$0xff] }
 0x3fc   :  { %v1128_v16 = vpack.c.bf16 %v924_v15, %v923_v14 }
 0x3fe   :  { %1129 = vmatpush3.bf16.msra.mxu0 %v1128_v16 }
 0x3ff   :  { %1130 = vmatprep.subr.bf16.mxu0 %v1334_v35  ;;  %v1344_v35 = vmov 0  }
 0x400   :  { %1179 = vset.pattern.permute.xlu1 %v1344_v35  ;;  %1180 = vset.pattern.permute.xlu0 %v1344_v35 }
 0x453   :  { %v526_v17 = vpop.f32.mrb[2].mxu1 }
 0x454   :  { %530 = vst.msk [vmem:[#allocation4 + $0x18] sm:$0xff] %vm426_vm5, %v526_v17  ;;  %v1082_v19 = vpop.f32.mrb[3].mxu1 }
 0x4c4   :  { %v783_v21 = vpop.f32.mrb[2].mxu0 }
 0x4c5   :  { %788 = vrot.lane.b32.xlu0 %v783_v21, %s1341_s4  ;;  %v1096_v22 = vpop.f32.mrb[3].mxu0 }
 0x4c6   :  { %v653_v23 = vpop.f32.mrb[4].mxu1 }
 0x4c7   :  { %658 = vrot.lane.b32.xlu1 %v653_v23, %s1342_s12  ;;  %v1089_v4 = vpop.f32.mrb[5].mxu1 }
 0x4ca   :  { %v913_v24 = vpop.f32.mrb[6].mxu1 }
 0x4cb   :  { %395 = vrot.lane.b32.xlu1 %v1443_v20, %s1329_s3  ;;  %v1103_v25 = vpop.f32.mrb[7].mxu1  ;;  %918 = vrot.lane.b32.xlu0 %v913_v24, %s1343_s15 }
 0x4cf   :  { %930 = vperm.xlu1 %1179, %v927_v26  }
 0x537   :  { %v789_v27 = vpop.permute.xlu0 %788 }
 0x539   :  { %v659_v28 = vpop.permute.xlu1 %658 }
 0x53a   :  { %661 = vst.msk [vmem:[#allocation4 + $0x18] sm:$0xff] %vm545_vm4, %v659_v28 }
 0x53b   :  { %791 = vst.msk [vmem:[#allocation4 + $0x18] sm:$0xff] %vm675_vm2, %v789_v27 }
 0x53d   :  { %v396_v29 = vpop.permute.xlu1 %395  ;;  %v919_v30 = vpop.permute.xlu0 %918 }
 0x53e   :  { %398 = vst.msk [vmem:[#allocation4 + $0x10] sm:$0xff] %vm385_vm3, %v396_v29  ;;  %vm1008_vm3 = vcmask 453632  }
 0x53f   :  { %921 = vst.msk [vmem:[#allocation4 + $0x18] sm:$0xff] %vm805_vm0, %v919_v30 }
 0x545   :  { %v925_v20 = vld [vmem:[#allocation4 + $0x10] sm:$0xff] }
 0x546   :  { %v926_v31 = vld [vmem:[#allocation4 + $0x18] sm:$0xff] }
 0x547   :  { %v1131_v32 = vpack.c.bf16 %v926_v31, %v925_v20 }
 0x549   :  { %1132 = vmatpush3.bf16.msra.mxu0 %v1131_v32 }
 0x54c   :  { %1113 = vmatmul.mubr.msk.f32.vlgmr.msra.gmra.mrb[4].mxu0 %vm933_vm1, %v922_v36 }
 0x54e   :  { %v931_v34 = vpop.permute.xlu1 %930 }
 0x61f   :  { %v1003_v37 = vpop.f32.mrb[4].mxu0 }
 0x620   :  { %v1004_v38 = vadd.f32 %v1003_v37, %v931_v34  ;;  %v1114_v40 = vpop.f32.mrb[5].mxu0 }
 0x622   :  { %1229 = vtanh.f32 %v1004_v38 }
 0x62c   :  { %v1230_v41 = vpop.eup %1229 }
 0x62d   :  { %1009 = vst.msk [vmem:[#allocation12] sm:$0xf] %vm1008_vm3, %v1230_v41 }
 0x62e   :  { %1296 = shalt.err (!%p1293_p9)
}
 0x62f   :  { %s1297_s3 = scalar_lea.hbm %s1583_s7, 64 }
 0x630   :  { %p1298_p10 = scmp.ne.s32.totalorder %s1583_s7, %s1297_s3  ;;  %p1301_p11 = scmp.lt.u32.totalorder %s1297_s3, %s1583_s7 }
 0x632   :  { %p1303_p12 = pnand %p1301_p11, %p1298_p10 }
 0x634   :  { %1306 = shalt.err (!%p1303_p12)
}
 0x635   :  { %1019 = dma.vmem_to_hbm [thread:$0]  %s1017_s20, 64, %s1583_s7, [#allocation7]  }
 0x636   :  { %1313 = dma.done.wait [#allocation7], 64  }
 0x637   :  { %1314 = vsyncadd [#allocation7], 4294967232 }
 0x638   :  { %1023 = vsyncpa [#allocation6], 1 }
 0x639   :  { %1024 = vsyncpa [#allocation10], 1 }
 0x63a   :  { %1025 = vsyncpa [#allocation7], 1 }
 0x63b   :  { %1026 = vsyncpa [#allocation8], 1 }

</bundles_post_ra>
